<compile_context>
chip_gen: v7x
topology: tpu7x:2x2x1
jax: 0.10.0
libtpu: 0.0.40
codegen_flags: <defaults>
</compile_context>

<pallas_src>
import functools

import jax
import jax.numpy as jnp
from jax.experimental import pallas as pl
from jax.experimental.pallas import tpu as pltpu

# Channel sizes fixed by the P_net architecture.
_C_IN, _C1, _C2, _C3 = 3, 10, 16, 32
_C_HEADS = 2 + 4 + 10          # packed head channels: [logits | loc | landmarks]


# ---------------------------------------------------------------------------
# Fused kernel: one grid step == Bt batch elements; everything stays in vregs.
# ---------------------------------------------------------------------------
def _pnet_kernel(x_ref, t1_ref, b1_ref, a1_ref, t2_ref, b2_ref, a2_ref,
                 t3_ref, b3_ref, a3_ref, wh_ref, bh_ref, out_ref,
                 *, dims, dot_dtype):
    Ho1, Wo1, Hp1, Ho2, Ho3 = dims

    x = x_ref[...]                       # (Bt, H, W*Cin), already dot_dtype
    Bt = x.shape[0]

    def conv_prelu(inp, t_ref, b_ref, a_ref, h_out):
        # 3x3 valid conv (stride 1) over lane-dense rows, batched over Bt images:
        # matmul ALL rows once per ki, then combine the three row-shifted slices.
        bt, h_in, _ = inp.shape
        flat = inp.reshape(bt * h_in, inp.shape[-1]).astype(dot_dtype)
        z = []
        for ki in range(3):
            zi = jnp.dot(flat, t_ref[ki], preferred_element_type=jnp.float32)
            z.append(zi.reshape(bt, h_in, zi.shape[-1]))
        acc = z[0][:, 0:h_out] + z[1][:, 1:h_out + 1] + z[2][:, 2:h_out + 2]
        y = acc + b_ref[...]                              # f32 bias
        return jnp.where(y >= 0.0, y, a_ref[...] * y)     # f32 per-channel PReLU

    # conv1 + PReLU : (Bt, H, W*Cin) -> (Bt, Ho1, Wo1*C1)  (f32)
    y1 = conv_prelu(x, t1_ref, b1_ref, a1_ref, Ho1)

    # ---- 2x2 stride-2 ceil-mode maxpool, no VMEM scratch ------------------
    # rows: pairwise max, keep even rows (pure value ops; Hp1 is small here).
    rows = []
    for i in range(Hp1):
        r = y1[:, 2 * i:2 * i + 1, :]
        if 2 * i + 1 < Ho1:
            r = jnp.maximum(r, y1[:, 2 * i + 1:2 * i + 2, :])
        rows.append(r)
    rowmax = rows[0] if Hp1 == 1 else jnp.concatenate(rows, axis=1)

    # columns: lane-shift by one C1 block + max; ceil-mode edge handled by
    # truncation (last unpaired block appended as-is for odd Wo1).  The stride-2
    # column selection is folded into t2, so pooled column j lives at block 2j
    # and the odd blocks (junk) are multiplied by zeros inside t2.
    if Wo1 > 1:
        colmax = jnp.maximum(rowmax[:, :, :(Wo1 - 1) * _C1], rowmax[:, :, _C1:])
        if Wo1 % 2 == 1:
            colmax = jnp.concatenate(
                [colmax, rowmax[:, :, (Wo1 - 1) * _C1:]], axis=2)
    else:
        colmax = rowmax

    # conv2 + PReLU : (Bt, Hp1, n2_blocks*C1) -> (Bt, Ho2, Wo2*C2)
    y2 = conv_prelu(colmax, t2_ref, b2_ref, a2_ref, Ho2)
    # conv3 + PReLU : (Bt, Ho2, Wo2*C2) -> (Bt, Ho3, Wo3*C3)
    y3 = conv_prelu(y2, t3_ref, b3_ref, a3_ref, Ho3)

    # fused 1x1-conv heads: one block-diagonal matmul over all Bt*Ho3 rows
    y3f = y3.reshape(Bt * Ho3, y3.shape[-1]).astype(dot_dtype)
    out = jnp.dot(y3f, wh_ref[...], preferred_element_type=jnp.float32) + bh_ref[...]
    out_ref[...] = out.reshape(Bt, Ho3, out.shape[-1]).astype(out_ref.dtype)


# ---------------------------------------------------------------------------
# Host-side weight preparation (runs once under jit; pure layout plumbing)
# ---------------------------------------------------------------------------
def _toeplitz_conv_weight(w_hwio, n_in_blocks, w_out, in_stride=1):
    """Expand (KH,KW,Cin,Cout) conv weights into KH row-matmul matrices.

    T[ki][(in_stride*(wo+kj))*Cin + ci, wo*Cout + co] = w[ki, kj, ci, co]
    so that  y_row[ho] = sum_ki x_row[ho+ki] @ T[ki]  is the valid conv over the
    width dimension, where logical input column p lives at block in_stride*p of
    the lane-dense row (in_stride=2 folds the maxpool column decimation in).
    """
    KH, KW, Cin, Cout = w_hwio.shape
    wo_idx = jnp.arange(w_out)
    mats = []
    for ki in range(KH):
        t = jnp.zeros((n_in_blocks, Cin, w_out, Cout), w_hwio.dtype)
        for kj in range(KW):
            t = t.at[in_stride * (wo_idx + kj), :, wo_idx, :].set(
                w_hwio[ki, kj][None, :, :])
        mats.append(t.reshape(n_in_blocks * Cin, w_out * Cout))
    return jnp.stack(mats, axis=0)       # (KH, n_in_blocks*Cin, w_out*Cout)


def _tile_row(v, w_out):
    """Per-channel vector -> per-(wo,channel) row of shape (1, w_out*C)."""
    return jnp.tile(v, w_out)[None, :]


def _pick_batch_tile(n, h, target_rows=256):
    """Largest divisor Bt of n with Bt*h <= target_rows and grid length >= 2."""
    bt = 1
    for d in range(1, n + 1):
        if n % d == 0 and d * h <= target_rows and n // d >= 2:
            bt = d
    return bt


# ---------------------------------------------------------------------------
# Parameters (deterministic synthetic init; random per-channel PReLU slopes)
# ---------------------------------------------------------------------------
def init_params(key):
    ks = jax.random.split(key, 15)

    def conv_w(k, kh, kw, cin, cout):
        fan_in = kh * kw * cin
        return jax.random.normal(k, (kh, kw, cin, cout), jnp.float32) / jnp.sqrt(fan_in)

    def bias(k, cout):
        return 0.01 * jax.random.normal(k, (cout,), jnp.float32)

    def alpha(k, cout):
        return 0.1 + 0.3 * jax.random.uniform(k, (cout,), jnp.float32)

    return {
        "w1": conv_w(ks[0], 3, 3, _C_IN, _C1), "b1": bias(ks[1], _C1), "a1": alpha(ks[2], _C1),
        "w2": conv_w(ks[3], 3, 3, _C1, _C2),   "b2": bias(ks[4], _C2), "a2": alpha(ks[5], _C2),
        "w3": conv_w(ks[6], 3, 3, _C2, _C3),   "b3": bias(ks[7], _C3), "a3": alpha(ks[8], _C3),
        # 1x1 conv heads stored as (Cin, Cout) matrices
        "wl": jax.random.normal(ks[9], (_C3, 2), jnp.float32) / jnp.sqrt(float(_C3)),
        "bl": bias(ks[10], 2),
        "wb": jax.random.normal(ks[11], (_C3, 4), jnp.float32) / jnp.sqrt(float(_C3)),
        "bb": bias(ks[12], 4),
        "wm": jax.random.normal(ks[13], (_C3, 10), jnp.float32) / jnp.sqrt(float(_C3)),
        "bm": bias(ks[14], 10),
    }


# ---------------------------------------------------------------------------
# Full forward pass (P_net.forward): NCHW in, (logits, loc, landmarks) NCHW out
# ---------------------------------------------------------------------------
def p_net_forward(params, x_nchw, *, dot_dtype=jnp.bfloat16):
    N, Cin, H, W = x_nchw.shape
    assert Cin == _C_IN and H >= 12 and W >= 12      # P-Net minimum input is 12x12
    Ho1, Wo1 = H - 2, W - 2
    Hp1, Wp1 = -(-Ho1 // 2), -(-Wo1 // 2)            # ceil_mode pooling sizes
    Ho2, Wo2 = Hp1 - 2, Wp1 - 2
    Ho3, Wo3 = Ho2 - 2, Wo2 - 2

    Bt = _pick_batch_tile(N, H)                      # images per grid step

    # lane-dense row layout: rows = height, cols = width*channels (bf16 operands)
    x_rows = jnp.transpose(x_nchw, (0, 2, 3, 1)).reshape(N, H, W * Cin).astype(dot_dtype)

    # conv weights -> row-Toeplitz matmul matrices; bias / PReLU tiled per column.
    # t2 reads the un-decimated pooled row: pooled column j lives at block 2j.
    n2_blocks = Wo1 if (Wo1 % 2 == 1 or Wo1 == 1) else Wo1 - 1
    t1 = _toeplitz_conv_weight(params["w1"], W, Wo1).astype(dot_dtype)
    t2 = _toeplitz_conv_weight(params["w2"], n2_blocks, Wo2, in_stride=2).astype(dot_dtype)
    t3 = _toeplitz_conv_weight(params["w3"], Wo2, Wo3).astype(dot_dtype)
    b1, a1 = _tile_row(params["b1"], Wo1), _tile_row(params["a1"], Wo1)
    b2, a2 = _tile_row(params["b2"], Wo2), _tile_row(params["a2"], Wo2)
    b3, a3 = _tile_row(params["b3"], Wo3), _tile_row(params["a3"], Wo3)

    # three 1x1-conv heads fused into one block-diagonal matmul
    wh_packed = jnp.concatenate([params["wl"], params["wb"], params["wm"]], axis=1)
    bh_packed = jnp.concatenate([params["bl"], params["bb"], params["bm"]], axis=0)
    eye = jnp.eye(Wo3, dtype=jnp.float32)
    wh = jnp.einsum("ij,ab->iajb", eye, wh_packed).reshape(
        Wo3 * _C3, Wo3 * _C_HEADS).astype(dot_dtype)
    bh = _tile_row(bh_packed, Wo3)

    kernel = functools.partial(_pnet_kernel, dims=(Ho1, Wo1, Hp1, Ho2, Ho3),
                               dot_dtype=dot_dtype)

    def full(arr):
        nd = arr.ndim
        return pl.BlockSpec(arr.shape, lambda n, _nd=nd: (0,) * _nd)

    out_packed = pl.pallas_call(
        kernel,
        out_shape=jax.ShapeDtypeStruct((N, Ho3, Wo3 * _C_HEADS), jnp.float32),
        grid=(N // Bt,),
        in_specs=[pl.BlockSpec((Bt, H, W * Cin), lambda n: (n, 0, 0)),
                  full(t1), full(b1), full(a1),
                  full(t2), full(b2), full(a2),
                  full(t3), full(b3), full(a3),
                  full(wh), full(bh)],
        out_specs=pl.BlockSpec((Bt, Ho3, Wo3 * _C_HEADS), lambda n: (n, 0, 0)),
        compiler_params=pltpu.CompilerParams(dimension_semantics=("parallel",)),
    )(x_rows, t1, b1, a1, t2, b2, a2, t3, b3, a3, wh, bh)

    out = out_packed.reshape(N, Ho3, Wo3, _C_HEADS)
    logits = jnp.transpose(out[..., 0:2], (0, 3, 1, 2))
    loc = jnp.transpose(out[..., 2:6], (0, 3, 1, 2))
    landmarks = jnp.transpose(out[..., 6:16], (0, 3, 1, 2))
    return logits, loc, landmarks


# ---------------------------------------------------------------------------
# Pure-JAX reference (no Pallas).  dot_dtype=None -> true f32 semantics;
# dot_dtype=bf16 -> operands rounded like the kernel's MXU inputs (f32 accumulate)
# so the comparison tolerance can be tight.
# ---------------------------------------------------------------------------
def _p_net_reference(params, x_nchw, dot_dtype=None):
    HIGH = jax.lax.Precision.HIGHEST

    def rnd(v):
        return v.astype(dot_dtype).astype(jnp.float32) if dot_dtype is not None else v

    x = jnp.transpose(x_nchw, (0, 2, 3, 1))

    def conv_prelu(x, w, b, a):
        KH, KW, Cin, Cout = w.shape
        N, H, W, _ = x.shape
        Ho, Wo = H - KH + 1, W - KW + 1
        patches = jnp.concatenate(
            [x[:, i:i + Ho, j:j + Wo, :] for i in range(KH) for j in range(KW)],
            axis=-1)
        y = jnp.dot(rnd(patches.reshape(N * Ho * Wo, KH * KW * Cin)),
                    rnd(w.reshape(KH * KW * Cin, Cout)), precision=HIGH) + b
        y = jnp.where(y >= 0.0, y, a * y)
        return y.reshape(N, Ho, Wo, Cout)

    def pool(x):
        N, H, W, C = x.shape
        Ho, Wo = -(-H // 2), -(-W // 2)
        xp = jnp.pad(x, ((0, 0), (0, 2 * Ho - H), (0, 2 * Wo - W), (0, 0)),
                     constant_values=-jnp.inf)
        return jnp.maximum(jnp.maximum(xp[:, 0::2, 0::2, :], xp[:, 0::2, 1::2, :]),
                           jnp.maximum(xp[:, 1::2, 0::2, :], xp[:, 1::2, 1::2, :]))

    h = conv_prelu(x, params["w1"], params["b1"], params["a1"])
    h = pool(h)
    h = conv_prelu(h, params["w2"], params["b2"], params["a2"])
    h = conv_prelu(h, params["w3"], params["b3"], params["a3"])

    def head(h, w, b):
        N, H, W, C = h.shape
        y = jnp.dot(rnd(h.reshape(N * H * W, C)), rnd(w), precision=HIGH) + b
        return jnp.transpose(y.reshape(N, H, W, -1), (0, 3, 1, 2))

    return (head(h, params["wl"], params["bl"]),
            head(h, params["wb"], params["bb"]),
            head(h, params["wm"], params["bm"]))


if __name__ == "__main__":
    key = jax.random.PRNGKey(0)
    kp, kx = jax.random.split(key)
    params = init_params(kp)

    # NCHW input like PyTorch: batch=2, channels=3, spatial=16x16
    x = jax.random.normal(kx, (2, 3, 16, 16), jnp.float32)

    fwd = jax.jit(functools.partial(p_net_forward, dot_dtype=jnp.bfloat16))
    logits, loc, landmarks = fwd(params, x)
    jax.block_until_ready((logits, loc, landmarks))

    # 16 -> conv(14) -> pool(7) -> conv(5) -> conv(3)
    assert logits.shape == (2, 2, 3, 3)
    assert loc.shape == (2, 4, 3, 3)
    assert landmarks.shape == (2, 10, 3, 3)
    assert all(bool(jnp.all(jnp.isfinite(t))) for t in (logits, loc, landmarks))

    # (a) tight check vs. a reference with identically-rounded bf16 matmul operands:
    #     only f32 accumulation order differs, so this catches layout/indexing bugs.
    ref_bf16 = _p_net_reference(params, x, dot_dtype=jnp.bfloat16)
    for name, got, want in zip(("logits", "loc", "landmarks"),
                               (logits, loc, landmarks), ref_bf16):
        scale = float(jnp.max(jnp.abs(want))) + 1e-6
        err = float(jnp.max(jnp.abs(got - want)))
        assert err <= 2e-3 * scale, f"{name}: bf16-ref mismatch max_err={err} scale={scale}"

    # (b) semantic check vs. the full-f32 reference (difference = bf16 operand rounding).
    ref_f32 = _p_net_reference(params, x)
    for name, got, want in zip(("logits", "loc", "landmarks"),
                               (logits, loc, landmarks), ref_f32):
        scale = float(jnp.max(jnp.abs(want))) + 1e-6
        err = float(jnp.max(jnp.abs(got - want)))
        assert err <= 3e-2 * scale, f"{name}: f32-ref mismatch max_err={err} scale={scale}"

    print("KERNEL_OK")
</pallas_src>

<mosaic_0001>
module attributes {stable_mosaic.version = 11 : i64} {
  func.func @_pnet_kernel(%arg0: i32, %arg1: memref<1x16x48xbf16, #tpu.memory_space<vmem>>, %arg2: memref<3x48x140xbf16, #tpu.memory_space<vmem>>, %arg3: memref<1x140xf32, #tpu.memory_space<vmem>>, %arg4: memref<1x140xf32, #tpu.memory_space<vmem>>, %arg5: memref<3x130x80xbf16, #tpu.memory_space<vmem>>, %arg6: memref<1x80xf32, #tpu.memory_space<vmem>>, %arg7: memref<1x80xf32, #tpu.memory_space<vmem>>, %arg8: memref<3x80x96xbf16, #tpu.memory_space<vmem>>, %arg9: memref<1x96xf32, #tpu.memory_space<vmem>>, %arg10: memref<1x96xf32, #tpu.memory_space<vmem>>, %arg11: memref<96x48xbf16, #tpu.memory_space<vmem>>, %arg12: memref<1x48xf32, #tpu.memory_space<vmem>>, %arg13: memref<1x3x48xf32, #tpu.memory_space<vmem>>) attributes {dimension_semantics = [#tpu.dimension_semantics<parallel>], iteration_bounds = array<i64: 2>, scalar_prefetch = 0 : i64, scratch_operands = 0 : i64, tpu.core_type = #tpu.core_type<tc>, window_params = [{transform_indices = @transform_0, window_bounds = array<i64: 1, 16, 48>}, {pipeline_mode = #tpu.pipeline_mode<synchronous>, transform_indices = @transform_1, window_bounds = array<i64: 3, 48, 140>}, {pipeline_mode = #tpu.pipeline_mode<synchronous>, transform_indices = @transform_2, window_bounds = array<i64: 1, 140>}, {pipeline_mode = #tpu.pipeline_mode<synchronous>, transform_indices = @transform_3, window_bounds = array<i64: 1, 140>}, {pipeline_mode = #tpu.pipeline_mode<synchronous>, transform_indices = @transform_4, window_bounds = array<i64: 3, 130, 80>}, {pipeline_mode = #tpu.pipeline_mode<synchronous>, transform_indices = @transform_5, window_bounds = array<i64: 1, 80>}, {pipeline_mode = #tpu.pipeline_mode<synchronous>, transform_indices = @transform_6, window_bounds = array<i64: 1, 80>}, {pipeline_mode = #tpu.pipeline_mode<synchronous>, transform_indices = @transform_7, window_bounds = array<i64: 3, 80, 96>}, {pipeline_mode = #tpu.pipeline_mode<synchronous>, transform_indices = @transform_8, window_bounds = array<i64: 1, 96>}, {pipeline_mode = #tpu.pipeline_mode<synchronous>, transform_indices = @transform_9, window_bounds = array<i64: 1, 96>}, {pipeline_mode = #tpu.pipeline_mode<synchronous>, transform_indices = @transform_10, window_bounds = array<i64: 96, 48>}, {pipeline_mode = #tpu.pipeline_mode<synchronous>, transform_indices = @transform_11, window_bounds = array<i64: 1, 48>}, {transform_indices = @transform_12, window_bounds = array<i64: 1, 3, 48>}]} {
    %c0 = arith.constant 0 : index
    %c0_0 = arith.constant 0 : index
    %c0_1 = arith.constant 0 : index
    %0 = vector.load %arg1[%c0, %c0_0, %c0_1] : memref<1x16x48xbf16, #tpu.memory_space<vmem>>, vector<1x16x48xbf16>
    %1 = vector.shape_cast %0 : vector<1x16x48xbf16> to vector<16x48xbf16>
    %c0_2 = arith.constant 0 : index
    %c0_3 = arith.constant 0 : index
    %c0_4 = arith.constant 0 : index
    %2 = vector.load %arg2[%c0_2, %c0_3, %c0_4] : memref<3x48x140xbf16, #tpu.memory_space<vmem>>, vector<1x48x140xbf16>
    %3 = vector.shape_cast %2 : vector<1x48x140xbf16> to vector<48x140xbf16>
    %cst = arith.constant dense<0.000000e+00> : vector<16x140xf32>
    %4 = tpu.matmul %1, %3, %cst {dimension_numbers = #tpu.dot_dimension_numbers<[1], [0], [0], [1], [0, 0, 1, 1], [], []>} : vector<16x48xbf16>, vector<48x140xbf16>, vector<16x140xf32> -> vector<16x140xf32>
    %5 = vector.shape_cast %4 : vector<16x140xf32> to vector<1x16x140xf32>
    %c1 = arith.constant 1 : index
    %c0_5 = arith.constant 0 : index
    %c0_6 = arith.constant 0 : index
    %6 = vector.load %arg2[%c1, %c0_5, %c0_6] : memref<3x48x140xbf16, #tpu.memory_space<vmem>>, vector<1x48x140xbf16>
    %7 = vector.shape_cast %6 : vector<1x48x140xbf16> to vector<48x140xbf16>
    %cst_7 = arith.constant dense<0.000000e+00> : vector<16x140xf32>
    %8 = tpu.matmul %1, %7, %cst_7 {dimension_numbers = #tpu.dot_dimension_numbers<[1], [0], [0], [1], [0, 0, 1, 1], [], []>} : vector<16x48xbf16>, vector<48x140xbf16>, vector<16x140xf32> -> vector<16x140xf32>
    %9 = vector.shape_cast %8 : vector<16x140xf32> to vector<1x16x140xf32>
    %c2 = arith.constant 2 : index
    %c0_8 = arith.constant 0 : index
    %c0_9 = arith.constant 0 : index
    %10 = vector.load %arg2[%c2, %c0_8, %c0_9] : memref<3x48x140xbf16, #tpu.memory_space<vmem>>, vector<1x48x140xbf16>
    %11 = vector.shape_cast %10 : vector<1x48x140xbf16> to vector<48x140xbf16>
    %cst_10 = arith.constant dense<0.000000e+00> : vector<16x140xf32>
    %12 = tpu.matmul %1, %11, %cst_10 {dimension_numbers = #tpu.dot_dimension_numbers<[1], [0], [0], [1], [0, 0, 1, 1], [], []>} : vector<16x48xbf16>, vector<48x140xbf16>, vector<16x140xf32> -> vector<16x140xf32>
    %13 = vector.shape_cast %12 : vector<16x140xf32> to vector<1x16x140xf32>
    %14 = vector.extract_strided_slice %5 {offsets = [0, 0, 0], sizes = [1, 14, 140], strides = [1, 1, 1]} : vector<1x16x140xf32> to vector<1x14x140xf32>
    %15 = vector.extract_strided_slice %9 {offsets = [0, 1, 0], sizes = [1, 14, 140], strides = [1, 1, 1]} : vector<1x16x140xf32> to vector<1x14x140xf32>
    %16 = arith.addf %14, %15 : vector<1x14x140xf32>
    %17 = vector.extract_strided_slice %13 {offsets = [0, 2, 0], sizes = [1, 14, 140], strides = [1, 1, 1]} : vector<1x16x140xf32> to vector<1x14x140xf32>
    %18 = arith.addf %16, %17 : vector<1x14x140xf32>
    %c0_11 = arith.constant 0 : index
    %c0_12 = arith.constant 0 : index
    %19 = vector.load %arg3[%c0_11, %c0_12] : memref<1x140xf32, #tpu.memory_space<vmem>>, vector<1x140xf32>
    %20 = vector.shape_cast %19 : vector<1x140xf32> to vector<1x1x140xf32>
    %21 = vector.broadcast %20 : vector<1x1x140xf32> to vector<1x14x140xf32>
    %22 = arith.addf %18, %21 : vector<1x14x140xf32>
    %cst_13 = arith.constant 0.000000e+00 : f32
    %23 = vector.broadcast %cst_13 : f32 to vector<1x14x140xf32>
    %24 = arith.cmpf oge, %22, %23 : vector<1x14x140xf32>
    %c0_14 = arith.constant 0 : index
    %c0_15 = arith.constant 0 : index
    %25 = vector.load %arg4[%c0_14, %c0_15] : memref<1x140xf32, #tpu.memory_space<vmem>>, vector<1x140xf32>
    %26 = vector.shape_cast %25 : vector<1x140xf32> to vector<1x1x140xf32>
    %27 = vector.broadcast %26 : vector<1x1x140xf32> to vector<1x14x140xf32>
    %28 = arith.mulf %27, %22 : vector<1x14x140xf32>
    %29 = arith.select %24, %22, %28 : vector<1x14x140xi1>, vector<1x14x140xf32>
    %30 = vector.extract_strided_slice %29 {offsets = [0, 0, 0], sizes = [1, 1, 140], strides = [1, 1, 1]} : vector<1x14x140xf32> to vector<1x1x140xf32>
    %31 = vector.extract_strided_slice %29 {offsets = [0, 1, 0], sizes = [1, 1, 140], strides = [1, 1, 1]} : vector<1x14x140xf32> to vector<1x1x140xf32>
    %32 = arith.maximumf %30, %31 : vector<1x1x140xf32>
    %33 = vector.extract_strided_slice %29 {offsets = [0, 2, 0], sizes = [1, 1, 140], strides = [1, 1, 1]} : vector<1x14x140xf32> to vector<1x1x140xf32>
    %34 = vector.extract_strided_slice %29 {offsets = [0, 3, 0], sizes = [1, 1, 140], strides = [1, 1, 1]} : vector<1x14x140xf32> to vector<1x1x140xf32>
    %35 = arith.maximumf %33, %34 : vector<1x1x140xf32>
    %36 = vector.extract_strided_slice %29 {offsets = [0, 4, 0], sizes = [1, 1, 140], strides = [1, 1, 1]} : vector<1x14x140xf32> to vector<1x1x140xf32>
    %37 = vector.extract_strided_slice %29 {offsets = [0, 5, 0], sizes = [1, 1, 140], strides = [1, 1, 1]} : vector<1x14x140xf32> to vector<1x1x140xf32>
    %38 = arith.maximumf %36, %37 : vector<1x1x140xf32>
    %39 = vector.extract_strided_slice %29 {offsets = [0, 6, 0], sizes = [1, 1, 140], strides = [1, 1, 1]} : vector<1x14x140xf32> to vector<1x1x140xf32>
    %40 = vector.extract_strided_slice %29 {offsets = [0, 7, 0], sizes = [1, 1, 140], strides = [1, 1, 1]} : vector<1x14x140xf32> to vector<1x1x140xf32>
    %41 = arith.maximumf %39, %40 : vector<1x1x140xf32>
    %42 = vector.extract_strided_slice %29 {offsets = [0, 8, 0], sizes = [1, 1, 140], strides = [1, 1, 1]} : vector<1x14x140xf32> to vector<1x1x140xf32>
    %43 = vector.extract_strided_slice %29 {offsets = [0, 9, 0], sizes = [1, 1, 140], strides = [1, 1, 1]} : vector<1x14x140xf32> to vector<1x1x140xf32>
    %44 = arith.maximumf %42, %43 : vector<1x1x140xf32>
    %45 = vector.extract_strided_slice %29 {offsets = [0, 10, 0], sizes = [1, 1, 140], strides = [1, 1, 1]} : vector<1x14x140xf32> to vector<1x1x140xf32>
    %46 = vector.extract_strided_slice %29 {offsets = [0, 11, 0], sizes = [1, 1, 140], strides = [1, 1, 1]} : vector<1x14x140xf32> to vector<1x1x140xf32>
    %47 = arith.maximumf %45, %46 : vector<1x1x140xf32>
    %48 = vector.extract_strided_slice %29 {offsets = [0, 12, 0], sizes = [1, 1, 140], strides = [1, 1, 1]} : vector<1x14x140xf32> to vector<1x1x140xf32>
    %49 = vector.extract_strided_slice %29 {offsets = [0, 13, 0], sizes = [1, 1, 140], strides = [1, 1, 1]} : vector<1x14x140xf32> to vector<1x1x140xf32>
    %50 = arith.maximumf %48, %49 : vector<1x1x140xf32>
    %51 = tpu.concatenate %32, %35, %38, %41, %44, %47, %50 in 1 : vector<1x1x140xf32>, vector<1x1x140xf32>, vector<1x1x140xf32>, vector<1x1x140xf32>, vector<1x1x140xf32>, vector<1x1x140xf32>, vector<1x1x140xf32> -> vector<1x7x140xf32>
    %52 = vector.extract_strided_slice %51 {offsets = [0, 0, 0], sizes = [1, 7, 130], strides = [1, 1, 1]} : vector<1x7x140xf32> to vector<1x7x130xf32>
    %53 = vector.extract_strided_slice %51 {offsets = [0, 0, 10], sizes = [1, 7, 130], strides = [1, 1, 1]} : vector<1x7x140xf32> to vector<1x7x130xf32>
    %54 = arith.maximumf %52, %53 : vector<1x7x130xf32>
    %55 = vector.shape_cast %54 : vector<1x7x130xf32> to vector<7x130xf32>
    %56 = arith.truncf %55 : vector<7x130xf32> to vector<7x130xbf16>
    %c0_16 = arith.constant 0 : index
    %c0_17 = arith.constant 0 : index
    %c0_18 = arith.constant 0 : index
    %57 = vector.load %arg5[%c0_16, %c0_17, %c0_18] : memref<3x130x80xbf16, #tpu.memory_space<vmem>>, vector<1x130x80xbf16>
    %58 = vector.shape_cast %57 : vector<1x130x80xbf16> to vector<130x80xbf16>
    %cst_19 = arith.constant dense<0.000000e+00> : vector<7x80xf32>
    %59 = tpu.matmul %56, %58, %cst_19 {dimension_numbers = #tpu.dot_dimension_numbers<[1], [0], [0], [1], [0, 0, 1, 1], [], []>} : vector<7x130xbf16>, vector<130x80xbf16>, vector<7x80xf32> -> vector<7x80xf32>
    %60 = vector.shape_cast %59 : vector<7x80xf32> to vector<1x7x80xf32>
    %c1_20 = arith.constant 1 : index
    %c0_21 = arith.constant 0 : index
    %c0_22 = arith.constant 0 : index
    %61 = vector.load %arg5[%c1_20, %c0_21, %c0_22] : memref<3x130x80xbf16, #tpu.memory_space<vmem>>, vector<1x130x80xbf16>
    %62 = vector.shape_cast %61 : vector<1x130x80xbf16> to vector<130x80xbf16>
    %cst_23 = arith.constant dense<0.000000e+00> : vector<7x80xf32>
    %63 = tpu.matmul %56, %62, %cst_23 {dimension_numbers = #tpu.dot_dimension_numbers<[1], [0], [0], [1], [0, 0, 1, 1], [], []>} : vector<7x130xbf16>, vector<130x80xbf16>, vector<7x80xf32> -> vector<7x80xf32>
    %64 = vector.shape_cast %63 : vector<7x80xf32> to vector<1x7x80xf32>
    %c2_24 = arith.constant 2 : index
    %c0_25 = arith.constant 0 : index
    %c0_26 = arith.constant 0 : index
    %65 = vector.load %arg5[%c2_24, %c0_25, %c0_26] : memref<3x130x80xbf16, #tpu.memory_space<vmem>>, vector<1x130x80xbf16>
    %66 = vector.shape_cast %65 : vector<1x130x80xbf16> to vector<130x80xbf16>
    %cst_27 = arith.constant dense<0.000000e+00> : vector<7x80xf32>
    %67 = tpu.matmul %56, %66, %cst_27 {dimension_numbers = #tpu.dot_dimension_numbers<[1], [0], [0], [1], [0, 0, 1, 1], [], []>} : vector<7x130xbf16>, vector<130x80xbf16>, vector<7x80xf32> -> vector<7x80xf32>
    %68 = vector.shape_cast %67 : vector<7x80xf32> to vector<1x7x80xf32>
    %69 = vector.extract_strided_slice %60 {offsets = [0, 0, 0], sizes = [1, 5, 80], strides = [1, 1, 1]} : vector<1x7x80xf32> to vector<1x5x80xf32>
    %70 = vector.extract_strided_slice %64 {offsets = [0, 1, 0], sizes = [1, 5, 80], strides = [1, 1, 1]} : vector<1x7x80xf32> to vector<1x5x80xf32>
    %71 = arith.addf %69, %70 : vector<1x5x80xf32>
    %72 = vector.extract_strided_slice %68 {offsets = [0, 2, 0], sizes = [1, 5, 80], strides = [1, 1, 1]} : vector<1x7x80xf32> to vector<1x5x80xf32>
    %73 = arith.addf %71, %72 : vector<1x5x80xf32>
    %c0_28 = arith.constant 0 : index
    %c0_29 = arith.constant 0 : index
    %74 = vector.load %arg6[%c0_28, %c0_29] : memref<1x80xf32, #tpu.memory_space<vmem>>, vector<1x80xf32>
    %75 = vector.shape_cast %74 : vector<1x80xf32> to vector<1x1x80xf32>
    %76 = vector.broadcast %75 : vector<1x1x80xf32> to vector<1x5x80xf32>
    %77 = arith.addf %73, %76 : vector<1x5x80xf32>
    %cst_30 = arith.constant 0.000000e+00 : f32
    %78 = vector.broadcast %cst_30 : f32 to vector<1x5x80xf32>
    %79 = arith.cmpf oge, %77, %78 : vector<1x5x80xf32>
    %c0_31 = arith.constant 0 : index
    %c0_32 = arith.constant 0 : index
    %80 = vector.load %arg7[%c0_31, %c0_32] : memref<1x80xf32, #tpu.memory_space<vmem>>, vector<1x80xf32>
    %81 = vector.shape_cast %80 : vector<1x80xf32> to vector<1x1x80xf32>
    %82 = vector.broadcast %81 : vector<1x1x80xf32> to vector<1x5x80xf32>
    %83 = arith.mulf %82, %77 : vector<1x5x80xf32>
    %84 = arith.select %79, %77, %83 : vector<1x5x80xi1>, vector<1x5x80xf32>
    %85 = vector.shape_cast %84 : vector<1x5x80xf32> to vector<5x80xf32>
    %86 = arith.truncf %85 : vector<5x80xf32> to vector<5x80xbf16>
    %c0_33 = arith.constant 0 : index
    %c0_34 = arith.constant 0 : index
    %c0_35 = arith.constant 0 : index
    %87 = vector.load %arg8[%c0_33, %c0_34, %c0_35] : memref<3x80x96xbf16, #tpu.memory_space<vmem>>, vector<1x80x96xbf16>
    %88 = vector.shape_cast %87 : vector<1x80x96xbf16> to vector<80x96xbf16>
    %cst_36 = arith.constant dense<0.000000e+00> : vector<5x96xf32>
    %89 = tpu.matmul %86, %88, %cst_36 {dimension_numbers = #tpu.dot_dimension_numbers<[1], [0], [0], [1], [0, 0, 1, 1], [], []>} : vector<5x80xbf16>, vector<80x96xbf16>, vector<5x96xf32> -> vector<5x96xf32>
    %90 = vector.shape_cast %89 : vector<5x96xf32> to vector<1x5x96xf32>
    %c1_37 = arith.constant 1 : index
    %c0_38 = arith.constant 0 : index
    %c0_39 = arith.constant 0 : index
    %91 = vector.load %arg8[%c1_37, %c0_38, %c0_39] : memref<3x80x96xbf16, #tpu.memory_space<vmem>>, vector<1x80x96xbf16>
    %92 = vector.shape_cast %91 : vector<1x80x96xbf16> to vector<80x96xbf16>
    %cst_40 = arith.constant dense<0.000000e+00> : vector<5x96xf32>
    %93 = tpu.matmul %86, %92, %cst_40 {dimension_numbers = #tpu.dot_dimension_numbers<[1], [0], [0], [1], [0, 0, 1, 1], [], []>} : vector<5x80xbf16>, vector<80x96xbf16>, vector<5x96xf32> -> vector<5x96xf32>
    %94 = vector.shape_cast %93 : vector<5x96xf32> to vector<1x5x96xf32>
    %c2_41 = arith.constant 2 : index
    %c0_42 = arith.constant 0 : index
    %c0_43 = arith.constant 0 : index
    %95 = vector.load %arg8[%c2_41, %c0_42, %c0_43] : memref<3x80x96xbf16, #tpu.memory_space<vmem>>, vector<1x80x96xbf16>
    %96 = vector.shape_cast %95 : vector<1x80x96xbf16> to vector<80x96xbf16>
    %cst_44 = arith.constant dense<0.000000e+00> : vector<5x96xf32>
    %97 = tpu.matmul %86, %96, %cst_44 {dimension_numbers = #tpu.dot_dimension_numbers<[1], [0], [0], [1], [0, 0, 1, 1], [], []>} : vector<5x80xbf16>, vector<80x96xbf16>, vector<5x96xf32> -> vector<5x96xf32>
    %98 = vector.shape_cast %97 : vector<5x96xf32> to vector<1x5x96xf32>
    %99 = vector.extract_strided_slice %90 {offsets = [0, 0, 0], sizes = [1, 3, 96], strides = [1, 1, 1]} : vector<1x5x96xf32> to vector<1x3x96xf32>
    %100 = vector.extract_strided_slice %94 {offsets = [0, 1, 0], sizes = [1, 3, 96], strides = [1, 1, 1]} : vector<1x5x96xf32> to vector<1x3x96xf32>
    %101 = arith.addf %99, %100 : vector<1x3x96xf32>
    %102 = vector.extract_strided_slice %98 {offsets = [0, 2, 0], sizes = [1, 3, 96], strides = [1, 1, 1]} : vector<1x5x96xf32> to vector<1x3x96xf32>
    %103 = arith.addf %101, %102 : vector<1x3x96xf32>
    %c0_45 = arith.constant 0 : index
    %c0_46 = arith.constant 0 : index
    %104 = vector.load %arg9[%c0_45, %c0_46] : memref<1x96xf32, #tpu.memory_space<vmem>>, vector<1x96xf32>
    %105 = vector.shape_cast %104 : vector<1x96xf32> to vector<1x1x96xf32>
    %106 = vector.broadcast %105 : vector<1x1x96xf32> to vector<1x3x96xf32>
    %107 = arith.addf %103, %106 : vector<1x3x96xf32>
    %cst_47 = arith.constant 0.000000e+00 : f32
    %108 = vector.broadcast %cst_47 : f32 to vector<1x3x96xf32>
    %109 = arith.cmpf oge, %107, %108 : vector<1x3x96xf32>
    %c0_48 = arith.constant 0 : index
    %c0_49 = arith.constant 0 : index
    %110 = vector.load %arg10[%c0_48, %c0_49] : memref<1x96xf32, #tpu.memory_space<vmem>>, vector<1x96xf32>
    %111 = vector.shape_cast %110 : vector<1x96xf32> to vector<1x1x96xf32>
    %112 = vector.broadcast %111 : vector<1x1x96xf32> to vector<1x3x96xf32>
    %113 = arith.mulf %112, %107 : vector<1x3x96xf32>
    %114 = arith.select %109, %107, %113 : vector<1x3x96xi1>, vector<1x3x96xf32>
    %115 = vector.shape_cast %114 : vector<1x3x96xf32> to vector<3x96xf32>
    %116 = arith.truncf %115 : vector<3x96xf32> to vector<3x96xbf16>
    %c0_50 = arith.constant 0 : index
    %c0_51 = arith.constant 0 : index
    %117 = vector.load %arg11[%c0_50, %c0_51] : memref<96x48xbf16, #tpu.memory_space<vmem>>, vector<96x48xbf16>
    %cst_52 = arith.constant dense<0.000000e+00> : vector<3x48xf32>
    %118 = tpu.matmul %116, %117, %cst_52 {dimension_numbers = #tpu.dot_dimension_numbers<[1], [0], [0], [1], [0, 0, 1, 1], [], []>} : vector<3x96xbf16>, vector<96x48xbf16>, vector<3x48xf32> -> vector<3x48xf32>
    %c0_53 = arith.constant 0 : index
    %c0_54 = arith.constant 0 : index
    %119 = vector.load %arg12[%c0_53, %c0_54] : memref<1x48xf32, #tpu.memory_space<vmem>>, vector<1x48xf32>
    %120 = vector.broadcast %119 : vector<1x48xf32> to vector<3x48xf32>
    %121 = arith.addf %118, %120 : vector<3x48xf32>
    %122 = vector.shape_cast %121 : vector<3x48xf32> to vector<1x3x48xf32>
    %c0_55 = arith.constant 0 : index
    %c0_56 = arith.constant 0 : index
    %c0_57 = arith.constant 0 : index
    %123 = vector.load %arg13[%c0_55, %c0_56, %c0_57] : memref<1x3x48xf32, #tpu.memory_space<vmem>>, vector<1x3x48xf32>
    tpu.vector_store %arg13[%c0_55, %c0_56, %c0_57], %122 {strides = array<i32>} : memref<1x3x48xf32, #tpu.memory_space<vmem>>, vector<1x3x48xf32>,
    return
  }
  func.func @transform_0(%arg0: i32) -> (i32, i32, i32) {
    %c0_i32 = arith.constant 0 : i32
    %c0_i32_0 = arith.constant 0 : i32
    %c0_i32_1 = arith.constant 0 : i32
    return %arg0, %c0_i32, %c0_i32_0 : i32, i32, i32
  }
  func.func @transform_1(%arg0: i32) -> (i32, i32, i32) {
    %c0_i32 = arith.constant 0 : i32
    %c0_i32_0 = arith.constant 0 : i32
    %c0_i32_1 = arith.constant 0 : i32
    %c0_i32_2 = arith.constant 0 : i32
    return %c0_i32, %c0_i32_0, %c0_i32_1 : i32, i32, i32
  }
  func.func @transform_2(%arg0: i32) -> (i32, i32) {
    %c0_i32 = arith.constant 0 : i32
    %c0_i32_0 = arith.constant 0 : i32
    %c0_i32_1 = arith.constant 0 : i32
    return %c0_i32, %c0_i32_0 : i32, i32
  }
  func.func @transform_3(%arg0: i32) -> (i32, i32) {
    %c0_i32 = arith.constant 0 : i32
    %c0_i32_0 = arith.constant 0 : i32
    %c0_i32_1 = arith.constant 0 : i32
    return %c0_i32, %c0_i32_0 : i32, i32
  }
  func.func @transform_4(%arg0: i32) -> (i32, i32, i32) {
    %c0_i32 = arith.constant 0 : i32
    %c0_i32_0 = arith.constant 0 : i32
    %c0_i32_1 = arith.constant 0 : i32
    %c0_i32_2 = arith.constant 0 : i32
    return %c0_i32, %c0_i32_0, %c0_i32_1 : i32, i32, i32
  }
  func.func @transform_5(%arg0: i32) -> (i32, i32) {
    %c0_i32 = arith.constant 0 : i32
    %c0_i32_0 = arith.constant 0 : i32
    %c0_i32_1 = arith.constant 0 : i32
    return %c0_i32, %c0_i32_0 : i32, i32
  }
  func.func @transform_6(%arg0: i32) -> (i32, i32) {
    %c0_i32 = arith.constant 0 : i32
    %c0_i32_0 = arith.constant 0 : i32
    %c0_i32_1 = arith.constant 0 : i32
    return %c0_i32, %c0_i32_0 : i32, i32
  }
  func.func @transform_7(%arg0: i32) -> (i32, i32, i32) {
    %c0_i32 = arith.constant 0 : i32
    %c0_i32_0 = arith.constant 0 : i32
    %c0_i32_1 = arith.constant 0 : i32
    %c0_i32_2 = arith.constant 0 : i32
    return %c0_i32, %c0_i32_0, %c0_i32_1 : i32, i32, i32
  }
  func.func @transform_8(%arg0: i32) -> (i32, i32) {
    %c0_i32 = arith.constant 0 : i32
    %c0_i32_0 = arith.constant 0 : i32
    %c0_i32_1 = arith.constant 0 : i32
    return %c0_i32, %c0_i32_0 : i32, i32
  }
  func.func @transform_9(%arg0: i32) -> (i32, i32) {
    %c0_i32 = arith.constant 0 : i32
    %c0_i32_0 = arith.constant 0 : i32
    %c0_i32_1 = arith.constant 0 : i32
    return %c0_i32, %c0_i32_0 : i32, i32
  }
  func.func @transform_10(%arg0: i32) -> (i32, i32) {
    %c0_i32 = arith.constant 0 : i32
    %c0_i32_0 = arith.constant 0 : i32
    %c0_i32_1 = arith.constant 0 : i32
    return %c0_i32, %c0_i32_0 : i32, i32
  }
  func.func @transform_11(%arg0: i32) -> (i32, i32) {
    %c0_i32 = arith.constant 0 : i32
    %c0_i32_0 = arith.constant 0 : i32
    %c0_i32_1 = arith.constant 0 : i32
    return %c0_i32, %c0_i32_0 : i32, i32
  }
  func.func @transform_12(%arg0: i32) -> (i32, i32, i32) {
    %c0_i32 = arith.constant 0 : i32
    %c0_i32_0 = arith.constant 0 : i32
    %c0_i32_1 = arith.constant 0 : i32
    return %arg0, %c0_i32, %c0_i32_0 : i32, i32, i32
  }
}

</mosaic_0001>

<bundles_post_ra>
// kernel: tile.38
= control target key start
LH: loop header
LB: loop body
LE: loop exit
PB: predicated region body
PF: predicated region fallthrough
CT: control target
= control target key end

     0   :  { %s28_s0 = inlined_call_operand.vmem [shape: f32[10], index: 0, kind: input, shape index: {}]   ;;  %s29_s1 = inlined_call_operand.vmem [shape: f32[14,10], index: 1, kind: output, shape index: {}]  }
   0x1   :  { %v4_v0 = vld [vmem:[%s28_s0] ss:$0 sm:$0xff] }
   0x2   :  { %5 = vst [vmem:[%s29_s1] sm:$0xff] %v4_v0  ;;  %8 = vst [vmem:[%s29_s1 + $0x8] sm:$0xff] %v4_v0 }

// kernel: tile.39
= control target key start
LH: loop header
LB: loop body
LE: loop exit
PB: predicated region body
PF: predicated region fallthrough
CT: control target
= control target key end

     0   :  { %vm9_vm0 = vcmask 64512   ;;  %s130_s12 = smov 120   ;;  %s131_s13 = smov 100   ;;  %vm3_vm1 = vcmask 80896   ;;  %vm13_vm2 = vcmask 15360   ;;  %vm16_vm3 = vcmask 1048512   ;;  %s204_s0 = inlined_call_operand.vmem [shape: f32[14,10], index: 0, kind: input, shape index: {}]   ;;  %s205_s1 = inlined_call_operand.vmem [shape: f32[1,140], index: 1, kind: output, shape index: {}]  }
   0x1   :  { %v102_v0 = vld [vmem:[%s204_s0 + $0xc] sm:$0x1]   ;;  %v105_v3 = vld [vmem:[%s204_s0 + $0xa] sm:$0x1]   ;;  %v104_v4 = vld [vmem:[%s204_s0 + $0xb] sm:$0x1]  }
   0x2   :  { %v103_v1 = vld [vmem:[%s204_s0 + $0xc] sm:$0x1]   ;;  %26 = vrot.lane.b32.xlu1 %v105_v3, %s131_s13  ;;  %v106_v5 = vld [vmem:[%s204_s0 + $0x9] sm:$0x1]   ;;  %s132_s18 = smov 110   ;;  %s133_s19 = smov 90  }
   0x3   :  { %v10_v2 = vsel %vm9_vm0, %v103_v1, %v102_v0  ;;  %v107_v6 = vld [vmem:[%s204_s0 + $0x8] sm:$0x1]   ;;  %v108_v7 = vld [vmem:[%s204_s0 + $0x7] sm:$0x1]   ;;  %v2_v8 = vld [vmem:[%s204_s0] sm:$0x1]  }
   0x4   :  { %11 = vrot.lane.b32.xlu0 %v10_v2, %s130_s12  ;;  %4 = vst.msk [vmem:[#allocation0] sm:$0x1] %vm3_vm1, %v2_v8   ;;  %s134_s26 = smov 80   ;;  %s135_s27 = smov 70   ;;  %v109_v9 = vld [vmem:[%s204_s0 + $0x6] sm:$0x1]  }
   0x5   :  { %v110_v10 = vld [vmem:[%s204_s0 + $0x5] sm:$0x1]   ;;  %s136_s3 = smov 60   ;;  %s137_s4 = smov 50   ;;  %v111_v11 = vld [vmem:[%s204_s0 + $0x4] sm:$0x1]  }
   0x6   :  { %32 = vrot.lane.b32.xlu1 %v106_v5, %s133_s19  ;;  %v112_v12 = vld [vmem:[%s204_s0 + $0x3] sm:$0x1]   ;;  %s138_s9 = smov 40   ;;  %s139_s10 = smov 30   ;;  %v113_v13 = vld [vmem:[%s204_s0 + $0x2] sm:$0x1]  }
   0x7   :  { %v114_v14 = vld [vmem:[%s204_s0 + $0x1] sm:$0x1]   ;;  %s140_s15 = smov 20   ;;  %s141_s16 = smov 10   ;;  %v115_v15 = vld [vmem:[%s204_s0 + $0xd] sm:$0x1]  }
   0x8   :  { %20 = vrot.lane.b32.xlu0 %v104_v4, %s132_s18  ;;  %s142_s0 = smov 2   ;;  %vm22_vm4 = vcmask 982896   ;;  %vm28_vm5 = vcmask 900896   ;;  %vm34_vm6 = vcmask 818896   ;;  %vm40_vm7 = vcmask 736896  }
   0x9   :  { %vm46_vm8 = vcmask 654896   ;;  %vm52_vm9 = vcmask 572896   ;;  %vm58_vm10 = vcmask 490896   ;;  %vm64_vm11 = vcmask 408896  }
   0xa   :  { %44 = vrot.lane.b32.xlu1 %v108_v7, %s135_s27  ;;  %vm70_vm12 = vcmask 326896   ;;  %vm76_vm13 = vcmask 244896   ;;  %vm82_vm14 = vcmask 162896   ;;  %vm88_vm15 = vcmask 97296  }
   0xc   :  { %38 = vrot.lane.b32.xlu0 %v107_v6, %s134_s26 }
   0xe   :  { %56 = vrot.lane.b32.xlu1 %v110_v10, %s137_s4 }
  0x10   :  { %50 = vrot.lane.b32.xlu0 %v109_v9, %s136_s3 }
  0x12   :  { %68 = vrot.lane.b32.xlu1 %v112_v12, %s139_s10 }
  0x14   :  { %62 = vrot.lane.b32.xlu0 %v111_v11, %s138_s9 }
  0x16   :  { %80 = vrot.lane.b32.xlu1 %v114_v14, %s141_s16 }
  0x18   :  { %74 = vrot.lane.b32.xlu0 %v113_v13, %s140_s15 }
  0x1c   :  { %86 = vrot.lane.b32.xlu0 %v115_v15, %s142_s0 }
  0x74   :  { %v27_v17 = vpop.permute.xlu1 %26  }
  0x76   :  { %v12_v16 = vpop.permute.xlu0 %11  }
  0x77   :  { %15 = vst.msk [vmem:[#allocation0 + $0x8] sm:$0x1] %vm13_vm2, %v12_v16  }
  0x78   :  { %17 = vst.msk [vmem:[#allocation0] sm:$0x1] %vm16_vm3, %v12_v16   ;;  %v33_v19 = vpop.permute.xlu1 %32  }
  0x7a   :  { %v21_v18 = vpop.permute.xlu0 %20  }
  0x7b   :  { %23 = vst.msk [vmem:[#allocation0] sm:$0x1] %vm22_vm4, %v21_v18  }
  0x7c   :  { %29 = vst.msk [vmem:[#allocation0] sm:$0x1] %vm28_vm5, %v27_v17   ;;  %v45_v21 = vpop.permute.xlu1 %44  }
  0x7d   :  { %35 = vst.msk [vmem:[#allocation0] sm:$0x1] %vm34_vm6, %v33_v19  }
  0x7e   :  { %v39_v20 = vpop.permute.xlu0 %38  }
  0x7f   :  { %41 = vst.msk [vmem:[#allocation0] sm:$0x1] %vm40_vm7, %v39_v20  }
  0x80   :  { %47 = vst.msk [vmem:[#allocation0] sm:$0x1] %vm46_vm8, %v45_v21   ;;  %v57_v23 = vpop.permute.xlu1 %56  }
  0x82   :  { %v51_v22 = vpop.permute.xlu0 %50  }
  0x83   :  { %53 = vst.msk [vmem:[#allocation0] sm:$0x1] %vm52_vm9, %v51_v22  }
  0x84   :  { %59 = vst.msk [vmem:[#allocation0] sm:$0x1] %vm58_vm10, %v57_v23   ;;  %v69_v25 = vpop.permute.xlu1 %68  }
  0x86   :  { %v63_v24 = vpop.permute.xlu0 %62  }
  0x87   :  { %65 = vst.msk [vmem:[#allocation0] sm:$0x1] %vm64_vm11, %v63_v24  }
  0x88   :  { %71 = vst.msk [vmem:[#allocation0] sm:$0x1] %vm70_vm12, %v69_v25   ;;  %v81_v27 = vpop.permute.xlu1 %80  }
  0x8a   :  { %v75_v26 = vpop.permute.xlu0 %74  }
  0x8b   :  { %77 = vst.msk [vmem:[#allocation0] sm:$0x1] %vm76_vm13, %v75_v26  }
  0x8c   :  { %83 = vst.msk [vmem:[#allocation0] sm:$0x1] %vm82_vm14, %v81_v27  }
  0x8e   :  { %v87_v28 = vpop.permute.xlu0 %86  }
  0x8f   :  { %90 = vst.msk [vmem:[#allocation0 + $0x8] sm:$0x1] %vm88_vm15, %v87_v28  }
  0x93   :  { %v94_v29 = vld [vmem:[#allocation0] sm:$0x1] }
  0x94   :  { %96 = vst [vmem:[%s205_s1] sm:$0x1] %v94_v29 }
  0x96   :  { %v98_v30 = vld [vmem:[#allocation0 + $0x8] sm:$0x1] }
  0x97   :  { %116 = vst [vmem:[%s205_s1 + $0x1] sm:$0x1] %v98_v30 }

// kernel: tile.48
= control target key start
LH: loop header
LB: loop body
LE: loop exit
PB: predicated region body
PF: predicated region fallthrough
CT: control target
= control target key end

     0   :  { %s22_s0 = inlined_call_operand.vmem [shape: f32[16], index: 0, kind: input, shape index: {}]   ;;  %s23_s1 = inlined_call_operand.vmem [shape: f32[5,16], index: 1, kind: output, shape index: {}]  }
   0x1   :  { %v4_v0 = vld [vmem:[%s22_s0] ss:$0 sm:$0xff] }
   0x2   :  { %5 = vst [vmem:[%s23_s1] sm:$0xff] %v4_v0 }

// kernel: tile.49
= control target key start
LH: loop header
LB: loop body
LE: loop exit
PB: predicated region body
PF: predicated region fallthrough
CT: control target
= control target key end

     0   :  { %s43_s10 = smov 64   ;;  %s44_s11 = smov 32   ;;  %vm3_vm0 = vcmask 130048   ;;  %vm9_vm1 = vcmask 654848   ;;  %vm15_vm2 = vcmask 523648   ;;  %vm21_vm3 = vcmask 392448   ;;  %s75_s0 = inlined_call_operand.vmem [shape: f32[5,16], index: 0, kind: input, shape index: {}]   ;;  %s76_s1 = inlined_call_operand.vmem [shape: f32[1,80], index: 1, kind: output, shape index: {}]  }
   0x1   :  { %v35_v0 = vld [vmem:[%s75_s0 + $0x4] sm:$0x1]   ;;  %v37_v1 = vld [vmem:[%s75_s0 + $0x2] sm:$0x1]   ;;  %v36_v2 = vld [vmem:[%s75_s0 + $0x3] sm:$0x1]  }
   0x2   :  { %7 = vrot.lane.b32.xlu0 %v35_v0, %s43_s10  ;;  %19 = vrot.lane.b32.xlu1 %v37_v1, %s44_s11  ;;  %v38_v3 = vld [vmem:[%s75_s0 + $0x1] sm:$0x1]   ;;  %v2_v4 = vld [vmem:[%s75_s0] sm:$0x1]   ;;  %s45_s0 = smov 48   ;;  %s46_s18 = smov 16  }
   0x3   :  { %4 = vst.msk [vmem:[#allocation0] sm:$0x1] %vm3_vm0, %v2_v4   ;;  %vm27_vm4 = vcmask 261248  }
   0x6   :  { %13 = vrot.lane.b32.xlu0 %v36_v2, %s45_s0  ;;  %25 = vrot.lane.b32.xlu1 %v38_v3, %s46_s18 }
  0x74   :  { %v8_v5 = vpop.permute.xlu0 %7   ;;  %v20_v6 = vpop.permute.xlu1 %19  }
  0x75   :  { %10 = vst.msk [vmem:[#allocation0] sm:$0x1] %vm9_vm1, %v8_v5  }
  0x78   :  { %v14_v7 = vpop.permute.xlu0 %13   ;;  %v26_v8 = vpop.permute.xlu1 %25  }
  0x79   :  { %16 = vst.msk [vmem:[#allocation0] sm:$0x1] %vm15_vm2, %v14_v7  }
  0x7a   :  { %22 = vst.msk [vmem:[#allocation0] sm:$0x1] %vm21_vm3, %v20_v6  }
  0x7b   :  { %28 = vst.msk [vmem:[#allocation0] sm:$0x1] %vm27_vm4, %v26_v8  }
  0x82   :  { %v32_v9 = vld [vmem:[#allocation0] sm:$0x1] }
  0x83   :  { %34 = vst [vmem:[%s76_s1] sm:$0x1] %v32_v9 }

// kernel: tile.68
= control target key start
LH: loop header
LB: loop body
LE: loop exit
PB: predicated region body
PF: predicated region fallthrough
CT: control target
= control target key end

     0   :  { %s22_s0 = inlined_call_operand.vmem [shape: f32[16], index: 0, kind: input, shape index: {}]   ;;  %s23_s1 = inlined_call_operand.vmem [shape: f32[3,16], index: 1, kind: output, shape index: {}]  }
   0x1   :  { %v4_v0 = vld [vmem:[%s22_s0] ss:$0 sm:$0xff] }
   0x2   :  { %5 = vst [vmem:[%s23_s1] sm:$0xf] %v4_v0 }

// kernel: tile.69
= control target key start
LH: loop header
LB: loop body
LE: loop exit
PB: predicated region body
PF: predicated region fallthrough
CT: control target
= control target key end

     0   :  { %vm7_vm0 = vcmask 130048   ;;  %s30_s8 = smov 16   ;;  %vm13_vm1 = vcmask 392448   ;;  %vm19_vm2 = vcmask 261248   ;;  %s47_s0 = inlined_call_operand.vmem [shape: f32[3,16], index: 0, kind: input, shape index: {}]   ;;  %s48_s1 = inlined_call_operand.vmem [shape: f32[1,48], index: 1, kind: output, shape index: {}]  }
   0x1   :  { %v4_v0 = vld [vmem:[%s47_s0] sm:$0xf]  ;;  %s29_s0 = smov 32  }
   0x2   :  { %5 = vst [vmem:[#allocation1] sm:$0xf] %v4_v0 }
   0x9   :  { %v10_v1 = vld [vmem:[#allocation1 + $0x2] sm:$0x1]   ;;  %v6_v2 = vld [vmem:[#allocation1] sm:$0x1]   ;;  %v16_v3 = vld [vmem:[#allocation1 + $0x1] sm:$0x1]  }
   0xa   :  { %11 = vrot.lane.b32.xlu0 %v10_v1, %s29_s0  ;;  %8 = vst.msk [vmem:[#allocation0] sm:$0x1] %vm7_vm0, %v6_v2  }
   0xe   :  { %17 = vrot.lane.b32.xlu0 %v16_v3, %s30_s8 }
  0x7c   :  { %v12_v4 = vpop.permute.xlu0 %11  }
  0x7d   :  { %14 = vst.msk [vmem:[#allocation0] sm:$0x1] %vm13_vm1, %v12_v4  }
  0x80   :  { %v18_v5 = vpop.permute.xlu0 %17  }
  0x81   :  { %20 = vst.msk [vmem:[#allocation0] sm:$0x1] %vm19_vm2, %v18_v5  }
  0x88   :  { %v24_v6 = vld [vmem:[#allocation0] sm:$0x1] }
  0x89   :  { %26 = vst [vmem:[%s48_s1] sm:$0x1] %v24_v6 }

// kernel: tile.58
= control target key start
LH: loop header
LB: loop body
LE: loop exit
PB: predicated region body
PF: predicated region fallthrough
CT: control target
= control target key end

     0   :  { %s22_s0 = inlined_call_operand.vmem [shape: f32[32], index: 0, kind: input, shape index: {}]   ;;  %s23_s1 = inlined_call_operand.vmem [shape: f32[3,32], index: 1, kind: output, shape index: {}]  }
   0x1   :  { %v4_v0 = vld [vmem:[%s22_s0] ss:$0 sm:$0xff] }
   0x2   :  { %5 = vst [vmem:[%s23_s1] sm:$0xf] %v4_v0 }

// kernel: tile.59
= control target key start
LH: loop header
LB: loop body
LE: loop exit
PB: predicated region body
PF: predicated region fallthrough
CT: control target
= control target key end

     0   :  { %vm7_vm0 = vcmask 261120   ;;  %s30_s8 = smov 32   ;;  %vm13_vm1 = vcmask 785920   ;;  %vm19_vm2 = vcmask 523520   ;;  %s47_s0 = inlined_call_operand.vmem [shape: f32[3,32], index: 0, kind: input, shape index: {}]   ;;  %s48_s1 = inlined_call_operand.vmem [shape: f32[1,96], index: 1, kind: output, shape index: {}]  }
   0x1   :  { %v4_v0 = vld [vmem:[%s47_s0] sm:$0xf]  ;;  %s29_s0 = smov 64  }
   0x2   :  { %5 = vst [vmem:[#allocation1] sm:$0xf] %v4_v0 }
   0x9   :  { %v10_v1 = vld [vmem:[#allocation1 + $0x2] sm:$0x1]   ;;  %v6_v2 = vld [vmem:[#allocation1] sm:$0x1]   ;;  %v16_v3 = vld [vmem:[#allocation1 + $0x1] sm:$0x1]  }
   0xa   :  { %11 = vrot.lane.b32.xlu0 %v10_v1, %s29_s0  ;;  %8 = vst.msk [vmem:[#allocation0] sm:$0x1] %vm7_vm0, %v6_v2  }
   0xe   :  { %17 = vrot.lane.b32.xlu0 %v16_v3, %s30_s8 }
  0x7c   :  { %v12_v4 = vpop.permute.xlu0 %11  }
  0x7d   :  { %14 = vst.msk [vmem:[#allocation0] sm:$0x1] %vm13_vm1, %v12_v4  }
  0x80   :  { %v18_v5 = vpop.permute.xlu0 %17  }
  0x81   :  { %20 = vst.msk [vmem:[#allocation0] sm:$0x1] %vm19_vm2, %v18_v5  }
  0x88   :  { %v24_v6 = vld [vmem:[#allocation0] sm:$0x1] }
  0x89   :  { %26 = vst [vmem:[%s48_s1] sm:$0x1] %v24_v6 }

// kernel: p_net_forward.1
= control target key start
LH: loop header
LB: loop body
LE: loop exit
PB: predicated region body
PF: predicated region fallthrough
CT: control target
= control target key end

     0   :  { %s2021_s21 = smov 0   ;;  %s2343_s0 = inlined_call_operand.vmem [shape: bf16[2,16,48], index: 0, kind: input, shape index: {}]   ;;  %s2344_s1 = inlined_call_operand.vmem [shape: bf16[3,48,140], index: 1, kind: input, shape index: {}]   ;;  %s2345_s2 = inlined_call_operand.vmem [shape: f32[1,140], index: 2, kind: input, shape index: {}]   ;;  %s2346_s3 = inlined_call_operand.vmem [shape: f32[1,140], index: 3, kind: input, shape index: {}]   ;;  %s2347_s4 = inlined_call_operand.vmem [shape: bf16[3,130,80], index: 4, kind: input, shape index: {}]   ;;  %s2348_s5 = inlined_call_operand.vmem [shape: f32[1,80], index: 5, kind: input, shape index: {}]   ;;  %s2349_s6 = inlined_call_operand.vmem [shape: f32[1,80], index: 6, kind: input, shape index: {}]   ;;  %s2350_s7 = inlined_call_operand.vmem [shape: bf16[3,80,96], index: 7, kind: input, shape index: {}]   ;;  %s2351_s8 = inlined_call_operand.vmem [shape: f32[1,96], index: 8, kind: input, shape index: {}]   ;;  %s2352_s9 = inlined_call_operand.vmem [shape: f32[1,96], index: 9, kind: input, shape index: {}]   ;;  %s2353_s10 = inlined_call_operand.vmem [shape: bf16[96,48], index: 10, kind: input, shape index: {}]   ;;  %s2354_s11 = inlined_call_operand.vmem [shape: f32[1,48], index: 11, kind: input, shape index: {}]   ;;  %s2355_s12 = inlined_call_operand.vmem [shape: f32[2,3,48], index: 12, kind: output, shape index: {}]  }
   0x1 LB: > { %s1609_s22 = sadd.s32 4294967295, %s1950_s21   ;;  %p1613_p0 = scmp.ge.s32.totalorder %s1950_s21, 1  ;;  %s1950_s21 = sphi %s2021_s21, %s22_s21  }
   0x2   : > { %p362_p1 = scmp.lt.s32.totalorder %s1950_s21, 3 }
   0x4   : > { %p363_p2 = pnand %p1613_p0, %p362_p1 }
   0x5   : > { %v1868_v0 = vld [vmem:[%s2344_s1 + $0x4] ss:$8 sps:$4 sm:$0xff] (!%p363_p2)   ;;  %p403_p3 = scmp.lt.s32.totalorder (!%p363_p2), %s1609_s22, 1  ;;  %v1870_v1 = vld [vmem:[%s2344_s1] ss:$8 sps:$4 sm:$0xff] (!%p363_p2)   ;;  %v1952_v2 = vmov (!%p363_p2), 0   ;;  %v703_v39 = vlaneseq (!%p363_p2) }
   0x6   : > { %366 = sbr.rel (%p363_p2) target bundleno = 1113 (0x459), region = 68  ;;  %492 = vmatprep.mubr.bf16.mxu1 (!%p363_p2), %v1952_v2  ;;  %652 = vmatprep.mubr.bf16.mxu0 (!%p363_p2), %v1952_v2  ;;  %v1871_v3 = vld [vmem:[%s2344_s1 + $0x14] ss:$8 sps:$4 sm:$0xff] (!%p363_p2)   ;;  %v1873_v4 = vld [vmem:[%s2344_s1 + $0x10] ss:$8 sps:$4 sm:$0xff] (!%p363_p2)   ;;  %vm456_vm0 = vcmask (!%p363_p2), 392192  }
   0x7   : > { %460 = vmatprep.subr.bf16.mxu1 (!%p363_p2), %v1868_v0  ;;  %v1874_v5 = vld [vmem:[%s2344_s1 + $0x24] ss:$8 sps:$4 sm:$0xff] (!%p363_p2)   ;;  %v1876_v7 = vld [vmem:[%s2344_s1 + $0x20] ss:$8 sps:$4 sm:$0xff] (!%p363_p2)   ;;  %v1882_v8 = vld [vmem:[%s2344_s1 + $0x34] ss:$8 sps:$4 sm:$0xff] (!%p363_p2)  }
   0x8   : > { %461 = vmatpush1.bf16.msra.mxu1 (!%p363_p2), %v1870_v1  ;;  %v1877_v6 = vld [vmem:[%s2344_s1 + $0x64] ss:$8 sps:$4 sm:$0xff] (!%p363_p2)   ;;  %v1883_v9 = vld [vmem:[%s2344_s1 + $0x60] ss:$8 sps:$4 sm:$0xff] (!%p363_p2)   ;;  %v1884_v10 = vld [vmem:[%s2344_s1 + $0x74] ss:$8 sps:$4 sm:$0xff] (!%p363_p2)  }
   0x9   : > { %462 = vmatprep.subr.bf16.mxu1 (!%p363_p2), %v1871_v3  ;;  %620 = vmatprep.subr.bf16.mxu0 (!%p363_p2), %v1877_v6  ;;  %v1880_v12 = vld [vmem:[%s2344_s1 + $0x30] ss:$8 sps:$4 sm:$0xff] (!%p363_p2)   ;;  %v1890_v14 = vld [vmem:[%s2344_s1 + $0x84] ss:$8 sps:$4 sm:$0xff] (!%p363_p2)   ;;  %v1895_v16 = vld [vmem:[%s2344_s1 + $0x80] ss:$8 sps:$4 sm:$0xff] (!%p363_p2)  }
   0xa   : > { %621 = vmatpush1.bf16.msra.mxu0 (!%p363_p2), %v1883_v9  ;;  %v1889_v13 = vld [vmem:[%s2344_s1 + $0x70] ss:$8 sps:$4 sm:$0xff] (!%p363_p2)   ;;  %v1888_v15 = vld [vmem:[%s2344_s1 + $0x44] ss:$8 sps:$4 sm:$0xff] (!%p363_p2)   ;;  %v1886_v17 = vld [vmem:[%s2344_s1 + $0x40] ss:$8 sps:$4 sm:$0xff] (!%p363_p2)  }
   0xb   : > { %622 = vmatprep.subr.bf16.mxu0 (!%p363_p2), %v1884_v10  ;;  %v1894_v18 = vld [vmem:[%s2344_s1 + $0x54] ss:$8 sps:$4 sm:$0xff] (!%p363_p2)   ;;  %v1892_v19 = vld [vmem:[%s2344_s1 + $0x50] ss:$8 sps:$4 sm:$0xff] (!%p363_p2)   ;;  %v1896_v20 = vld [vmem:[%s2347_s4] sm:$0xff] (!%p363_p2)   ;;  %vm686_vm1 = vcmask (!%p363_p2), 1045504  }
   0xc   : > { %463 = vmatpush1.bf16.msra.mxu1 (!%p363_p2), %v1873_v4  ;;  %v1897_v21 = vld [vmem:[%s2347_s4 + $0x44] sm:$0xff] (!%p363_p2)   ;;  %v1899_v23 = vld [vmem:[%s2347_s4 + $0x4c] sm:$0xff] (!%p363_p2)   ;;  %v1901_v25 = vld [vmem:[%s2347_s4 + $0x54] sm:$0xff] (!%p363_p2)   ;;  %v704_v46 = vshrl.u32 (!%p363_p2), %v703_v39, 7  ;;  %vm667_vm2 = vcmask (!%p363_p2), 1046528   ;;  %vm785_vm7 = vcmask (!%p363_p2), 1040384  }
   0xd   : > { %s2357_s22 = smov (!%p403_p3, %s1609_s22), 1  ;;  %464 = vmatprep.subr.bf16.mxu1 %v1874_v5  ;;  %v1898_v22 = vld [vmem:[%s2347_s4 + $0x8] sm:$0xff]   ;;  %v1900_v24 = vld [vmem:[%s2347_s4 + $0x10] sm:$0xff]   ;;  %v1902_v26 = vld [vmem:[%s2347_s4 + $0x18] sm:$0xff]   ;;  %vm788_vm8 = vcmask 1041408   ;;  %vm791_vm9 = vcmask 1042432  }
   0xe   : > { %s1767_s17 = sshll.u32 %s2357_s22, 3  ;;  %623 = vmatpush1.bf16.msra.mxu0 %v1889_v13  ;;  %v1903_v27 = vld [vmem:[%s2347_s4 + $0x5c] sm:$0xff]   ;;  %v1905_v29 = vld [vmem:[%s2347_s4 + $0x64] sm:$0xff]   ;;  %v1907_v31 = vld [vmem:[%s2347_s4 + $0x6c] sm:$0xff]   ;;  %v705_v53 = vsub.s32 0, %v704_v46  ;;  %v709_v56 = vsub.s32 1, %v704_v46 }
   0xf   : > { %s407_s20 = scalar_lea.vmem %s2343_s0, %s1767_s17  ;;  %624 = vmatprep.subr.bf16.mxu0 %v1890_v14  ;;  %v1904_v28 = vld [vmem:[%s2347_s4 + $0x20] sm:$0xff]   ;;  %v1906_v30 = vld [vmem:[%s2347_s4 + $0x28] sm:$0xff]   ;;  %v1908_v32 = vld [vmem:[%s2347_s4 + $0x30] sm:$0xff]   ;;  %vm794_vm10 = vcmask 1043456   ;;  %vm797_vm11 = vcmask 1044480   ;;  %vm808_vm12 = vcmask 965632  }
  0x10   : > { %v1879_v11 = vld [vmem:[%s407_s20] sm:$0xff]   ;;  %465 = vmatpush1.bf16.msra.mxu1 %v1876_v7  ;;  %v1909_v33 = vld [vmem:[%s2347_s4 + $0x74] sm:$0xff]   ;;  %s1953_s20 = smov 118   ;;  %vm884_vm13 = vcmask 15360   ;;  %vm1955_vm14 = vmmov 0   ;;  %s1616_s28 = sshll.u32 %s2357_s22, 2 }
  0x11   : > { %540 = vmatprep.subr.bf16.mxu1 %v1882_v8  ;;  %v1910_v34 = vld [vmem:[%s2347_s4 + $0x38] sm:$0xff]   ;;  %v701_v55 = vld [vmem:[%s2345_s2] sm:$0x3]  ;;  %s411_s15 = scalar_lea.vmem %s2355_s12, %s1616_s28 }
  0x12   : > { %625 = vmatpush1.bf16.msra.mxu0 %v1895_v16  ;;  %v721_v61 = vld [vmem:[%s2346_s3] sm:$0x3]  ;;  %v706_v1 = vrot.slane %v701_v55, %v705_v53  ;;  %v710_v6 = vrot.slane %v701_v55, %v709_v56 }
  0x13   : > { %1624 = vmatmul.mubr.msk.bf16.vlgmr.msra.gmra.mrb[0].mxu1 %vm456_vm0, %v1879_v11  ;;  %1003 = vmatprep.subr.bf16.mxu0 %v1952_v2  ;;  %v726_v8 = vrot.slane %v721_v61, %v705_v53 }
  0x14   : > { %541 = vmatpush1.bf16.msra.mxu1 %v1880_v12  ;;  %572 = vmatprep.mubr.bf16.mxu1 %v1952_v2  ;;  %v730_v12 = vrot.slane %v721_v61, %v709_v56 }
  0x15   : > { %542 = vmatprep.subr.bf16.mxu1 %v1888_v15  ;;  %1650 = vmatmul.mubr.msk.bf16.vlgmr.msra.gmra.mrb[0].mxu0 %vm456_vm0, %v1879_v11 }
  0x16   : > { %1004 = vmatpush1.bf16.msra.mxu0 %v1897_v21 }
  0x17   : > { %1005 = vmatprep.subr.bf16.mxu0 %v1952_v2 }
  0x18   : > { %543 = vmatpush1.bf16.msra.mxu1 %v1886_v17 }
  0x19   : > { %544 = vmatprep.subr.bf16.mxu1 %v1894_v18 }
  0x1a   : > { %1006 = vmatpush1.bf16.msra.mxu0 %v1899_v23 }
  0x1b   : > { %1007 = vmatprep.subr.bf16.mxu0 %v1952_v2 }
  0x1c   : > { %545 = vmatpush1.bf16.msra.mxu1 %v1892_v19 }
  0x1d   : > { %891 = vmatprep.subr.bf16.mxu1 %v1952_v2 }
  0x1e   : > { %1008 = vmatpush1.bf16.msra.mxu0 %v1901_v25 }
  0x1f   : > { %1637 = vmatmul.mubr.msk.bf16.vlgmr.msra.gmra.mrb[4].mxu1 %vm456_vm0, %v1879_v11  ;;  %1009 = vmatprep.subr.bf16.mxu0 %v1952_v2  ;;  %vm1222_vm0 = vcmask 654336  }
  0x20   : > { %892 = vmatpush1.bf16.msra.mxu1 %v1896_v20 }
  0x21   : > { %893 = vmatprep.subr.bf16.mxu1 %v1952_v2 }
  0x22   : > { %1010 = vmatpush1.bf16.msra.mxu0 %v1903_v27 }
  0x23   : > { %1011 = vmatprep.subr.bf16.mxu0 %v1952_v2 }
  0x24   : > { %894 = vmatpush1.bf16.msra.mxu1 %v1898_v22 }
  0x25   : > { %895 = vmatprep.subr.bf16.mxu1 %v1952_v2 }
  0x26   : > { %1012 = vmatpush1.bf16.msra.mxu0 %v1905_v29 }
  0x27   : > { %1013 = vmatprep.subr.bf16.mxu0 %v1952_v2 }
  0x28   : > { %896 = vmatpush1.bf16.msra.mxu1 %v1900_v24 }
  0x29   : > { %897 = vmatprep.subr.bf16.mxu1 %v1952_v2 }
  0x2a   : > { %1014 = vmatpush1.bf16.msra.mxu0 %v1907_v31 }
  0x2b   : > { %1015 = vmatprep.subr.bf16.mxu0 %v1952_v2 }
  0x2c   : > { %898 = vmatpush1.bf16.msra.mxu1 %v1902_v26 }
  0x2d   : > { %899 = vmatprep.subr.bf16.mxu1 %v1952_v2 }
  0x2e   : > { %1016 = vmatpush1.bf16.msra.mxu0 %v1909_v33 }
  0x2f   : > { %1017 = vmatprep.subr.bf16.mxu0 %v1952_v2 }
  0x30   : > { %900 = vmatpush1.bf16.msra.mxu1 %v1904_v28 }
  0x31   : > { %901 = vmatprep.subr.bf16.mxu1 %v1952_v2 }
  0x34   : > { %902 = vmatpush1.bf16.msra.mxu1 %v1906_v30 }
  0x35   : > { %903 = vmatprep.subr.bf16.mxu1 %v1952_v2 }
  0x38   : > { %904 = vmatpush1.bf16.msra.mxu1 %v1908_v32  ;;  %v1911_v32 = vld [vmem:[%s2347_s4 + $0x7c] sm:$0xff]  }
  0x39   : > { %905 = vmatprep.subr.bf16.mxu1 %v1952_v2  ;;  %1018 = vmatpush1.bf16.msra.mxu0 %v1911_v32 }
  0x3a   : > { %1019 = vmatprep.subr.bf16.mxu0 %v1952_v2 }
  0x3c   : > { %906 = vmatpush1.bf16.msra.mxu1 %v1910_v34 }
  0x3d   : > { %907 = vmatprep.subr.bf16.mxu1 %v1952_v2 }
  0xe6   : > { %v494_v35 = vpop.f32.mrb[0].mxu1 }
  0xe7   : > { %v496_v36 = vpop.f32.mrb[1].mxu1 }
  0xe8   : > { %v498_v37 = vpop.f32.mrb[2].mxu1  ;;  %v654_v40 = vpop.f32.mrb[0].mxu0 }
  0xe9   : > { %v500_v38 = vpop.f32.mrb[3].mxu1  ;;  %v687_v41 = vrot.slane %v654_v40, 2  ;;  %v656_v42 = vpop.f32.mrb[1].mxu0 }
  0xea   : > { %v690_v43 = vrot.slane %v656_v42, 2  ;;  %v658_v44 = vpop.f32.mrb[2].mxu0 }
  0xeb   : > { %v688_v45 = vrot.slane %v658_v44, 2  ;;  %v660_v47 = vpop.f32.mrb[3].mxu0 }
  0xec   : > { %v691_v48 = vrot.slane %v660_v47, 2 }
  0xed   : > { %v689_v49 = vsel %vm686_vm1, %v687_v41, %v688_v45 }
  0xee   : > { %v692_v51 = vsel %vm686_vm1, %v690_v43, %v691_v48  ;;  %v1912_v43 = vld [vmem:[%s2347_s4 + $0x40] ss:$0 sps:$4 sm:$0x11]  }
  0xf2   : > { %v574_v50 = vpop.f32.mrb[4].mxu1 }
  0xf3   : > { %v576_v52 = vpop.f32.mrb[5].mxu1  ;;  %v668_v57 = vrot.slane %v574_v50, 1 }
  0xf4   : > { %v578_v54 = vpop.f32.mrb[6].mxu1  ;;  %v671_v60 = vrot.slane %v576_v52, 1  ;;  %v889_v52 = vsel %vm785_vm7, %v1912_v43, 0 }
  0xf5   : > { %v669_v58 = vrot.slane %v578_v54, 1  ;;  %v580_v59 = vpop.f32.mrb[7].mxu1  ;;  %908 = vmatpush1.bf16.msra.mxu1 %v889_v52  ;;  %v1934_v52 = vld [vmem:[%s2350_s7 + $0x30] sm:$0xff]  }
  0xf6   : > { %v672_v62 = vrot.slane %v580_v59, 1  ;;  %1115 = vmatprep.subr.bf16.mxu1 %v1952_v2 }
  0xf7   : > { %v670_v63 = vsel %vm667_vm2, %v668_v57, %v669_v58  ;;  %v680_v0 = vadd.f32 %v669_v58, %v498_v37 }
  0xf8   : > { %v678_v3 = vadd.f32 %v670_v63, %v494_v35  ;;  %v673_v4 = vsel %vm667_vm2, %v671_v60, %v672_v62  ;;  %v681_v5 = vadd.f32 %v672_v62, %v500_v38  ;;  %vm1510_vm2 = vcmask 785408  }
  0xf9   : > { %v699_v7 = vadd.f32 %v688_v45, %v680_v0  ;;  %v679_v9 = vadd.f32 %v673_v4, %v496_v36 }
  0xfa   : > { %v697_v10 = vadd.f32 %v689_v49, %v678_v3  ;;  %v700_v11 = vadd.f32 %v691_v48, %v681_v5  ;;  %v1913_v48 = vld [vmem:[%s2347_s4 + $0x84] ss:$0 sps:$4 sm:$0x11]  }
  0xfb   : > { %v715_v13 = vadd.f32 %v706_v1, %v699_v7  ;;  %v698_v14 = vadd.f32 %v692_v51, %v679_v9  ;;  %v1001_v56 = vsel %vm785_vm7, %v1913_v48, 0 }
  0xfc   : > { %v713_v15 = vadd.f32 %v706_v1, %v697_v10  ;;  %v716_v16 = vadd.f32 %v710_v6, %v700_v11  ;;  %1020 = vmatpush1.bf16.msra.mxu0 %v1001_v56  ;;  %v1915_v10 = vld [vmem:[%s2347_s4 + $0x90] sm:$0xff]   ;;  %v1916_v11 = vld [vmem:[%s2347_s4 + $0x98] sm:$0xff]   ;;  %v1938_v56 = vld [vmem:[%s2353_s10] sm:$0xff]  }
  0xfd   : > { %vm719_vm3 = vcmp.ge.f32.partialorder %v715_v13, 0.0  ;;  %v735_v17 = vmul.f32 %v726_v8, %v715_v13  ;;  %v714_v18 = vadd.f32 %v710_v6, %v698_v14  ;;  %v1919_v14 = vld [vmem:[%s2347_s4 + $0xb0] sm:$0xff]  }
  0xfe   : > { %vm717_vm4 = vcmp.ge.f32.partialorder %v713_v15, 0.0  ;;  %v733_v19 = vmul.f32 %v726_v8, %v713_v15  ;;  %vm720_vm5 = vcmp.ge.f32.partialorder %v716_v16, 0.0  ;;  %v736_v20 = vmul.f32 %v730_v12, %v716_v16  ;;  %v1914_v8 = vld [vmem:[%s2347_s4 + $0x88] sm:$0xff]  }
  0xff   : > { %v739_v21 = vsel %vm719_vm3, %v715_v13, %v735_v17  ;;  %vm718_vm6 = vcmp.ge.f32.partialorder %v714_v18, 0.0  ;;  %v734_v22 = vmul.f32 %v730_v12, %v714_v18  ;;  %v1917_v12 = vld [vmem:[%s2347_s4 + $0xa0] sm:$0xff]   ;;  %v1918_v13 = vld [vmem:[%s2347_s4 + $0xa8] sm:$0xff]   ;;  %vm1554_vm3 = vcmask 387072  }
 0x100   : > { %v737_v23 = vsel %vm717_vm4, %v713_v15, %v733_v19  ;;  %v751_v24 = vrot.slane %v739_v21, 1  ;;  %v740_v25 = vsel %vm720_vm5, %v716_v16, %v736_v20  ;;  %v1920_v15 = vld [vmem:[%s2347_s4 + $0xb8] sm:$0xff]   ;;  %v1921_v16 = vld [vmem:[%s2347_s4 + $0xc0] sm:$0xff]   ;;  %v1922_v17 = vld [vmem:[%s2347_s4 + $0xc8] ss:$0 sps:$4 sm:$0x11]  }
 0x101   : > { %v743_v26 = vrot.slane %v737_v23, 1  ;;  %v738_v27 = vsel %vm718_vm6, %v714_v18, %v734_v22  ;;  %v752_v28 = vrot.slane %v740_v25, 1  ;;  %v1113_v18 = vsel %vm785_vm7, %v1922_v17, 0  ;;  %v1923_v19 = vld [vmem:[%s2350_s7] sm:$0xff]   ;;  %v1924_v20 = vld [vmem:[%s2350_s7 + $0x50] sm:$0xff]   ;;  %v1926_v22 = vld [vmem:[%s2350_s7 + $0x58] sm:$0xff]  }
 0x102   : > { %v744_v29 = vrot.slane %v738_v27, 1  ;;  %v755_v31 = vmax.f32 %v739_v21, %v751_v24  ;;  %v1954_v21 = vmov 0.0   ;;  %v1928_v24 = vld [vmem:[%s2350_s7 + $0x60] sm:$0xff]  }
 0x103   : > { %v747_v30 = vmax.f32 %v737_v23, %v743_v26  ;;  %v756_v34 = vmax.f32 %v740_v25, %v752_v28  ;;  %1793 = vmatprep.subr.bf16.mxu0 %v1954_v21  ;;  %v1927_v23 = vld [vmem:[%s2350_s7 + $0x10] sm:$0xff]   ;;  %v1929_v25 = vld [vmem:[%s2350_s7 + $0x18] sm:$0xff]   ;;  %v1930_v26 = vld [vmem:[%s2350_s7 + $0x68] sm:$0xff]  }
 0x104   : > { %v748_v33 = vmax.f32 %v738_v27, %v744_v29  ;;  %v773_v40 = vrot.slane %v755_v31, 4  ;;  %v777_v41 = vrot.slane %v755_v31, 5  ;;  %v781_v45 = vrot.slane %v755_v31, 6  ;;  %v1931_v27 = vld [vmem:[%s2350_s7 + $0x20] sm:$0xff]   ;;  %v1932_v28 = vld [vmem:[%s2350_s7 + $0x70] sm:$0xff]  }
 0x105   : > { %v759_v35 = vrot.slane %v747_v30, 1  ;;  %v763_v36 = vrot.slane %v747_v30, 2  ;;  %v767_v39 = vrot.slane %v747_v30, 3  ;;  %v774_v49 = vrot.slane %v756_v34, 4 }
 0x106   : > { %v760_v37 = vrot.slane %v748_v33, 1  ;;  %v764_v38 = vrot.slane %v748_v33, 2  ;;  %v768_v44 = vrot.slane %v748_v33, 3  ;;  %v778_v53 = vrot.slane %v756_v34, 5 }
 0x107   : > { %v786_v42 = vsel %vm785_vm7, %v747_v30, %v759_v35  ;;  %v782_v57 = vrot.slane %v756_v34, 6 }
 0x108   : > { %v787_v46 = vsel %vm785_vm7, %v748_v33, %v760_v37  ;;  %v789_v47 = vsel %vm788_vm8, %v786_v42, %v763_v36  ;;  %v1715_v42 = vld [vmem:[%s2348_s5] ss:$0 sm:$0xff] }
 0x109   : > { %v790_v50 = vsel %vm788_vm8, %v787_v46, %v764_v38  ;;  %v792_v51 = vsel %vm791_vm9, %v789_v47, %v767_v39  ;;  %v1716_v46 = vld [vmem:[%s2349_s6] ss:$0 sm:$0xff] }
 0x10a   : > { %v793_v54 = vsel %vm791_vm9, %v790_v50, %v768_v44  ;;  %v795_v55 = vsel %vm794_vm10, %v792_v51, %v773_v40  ;;  %v1933_v50 = vld [vmem:[%s2350_s7 + $0x28] sm:$0xff]  }
 0x10b   : > { %v796_v58 = vsel %vm794_vm10, %v793_v54, %v774_v49  ;;  %v798_v59 = vsel %vm797_vm11, %v795_v55, %v777_v41  ;;  %v1936_v54 = vld [vmem:[%s2350_s7 + $0x40] sm:$0xff]   ;;  %v1937_v55 = vld [vmem:[%s2350_s7 + $0x48] sm:$0xff]  }
 0x10c   : > { %v799_v60 = vsel %vm797_vm11, %v796_v58, %v778_v53  ;;  %v800_v61 = vsel %vm686_vm1, %v798_v59, %v781_v45  ;;  %v1935_v53 = vld [vmem:[%s2350_s7 + $0x38] sm:$0xff]   ;;  %v1940_v58 = vld [vmem:[%s2353_s10 + $0x10] sm:$0xff]  }
 0x10d   : > { %v801_v62 = vsel %vm686_vm1, %v799_v60, %v782_v57  ;;  %v1939_v57 = vld [vmem:[%s2353_s10 + $0x8] sm:$0xff]   ;;  %v1941_v59 = vld [vmem:[%s2353_s10 + $0x18] sm:$0xff]   ;;  %v1942_v60 = vld [vmem:[%s2353_s10 + $0x20] sm:$0xff]  }
 0x10e   : > { %v1863_v63 = vpack.i.bf16 %v801_v62, %v800_v61 }
 0x110   : > { %1864 = vrot.lane.b32.xlu0 %v1863_v63, %s1953_s20 }
 0x182   : > { %v1865_v0 = vpop.permute.xlu0 %1864 }
 0x183   : > { %v1867_v1 = vunpack.i.h.bf16 %v1865_v0  ;;  %v1866_v3 = vunpack.i.l.bf16 %v1865_v0 }
 0x185   : > { %v813_v4 = vmax.f32 %v801_v62, %v1867_v1  ;;  %v809_v5 = vsel %vm808_vm12, %v1866_v3, %v1867_v1 }
 0x186   : > { %v812_v6 = vmax.f32 %v800_v61, %v809_v5  ;;  %v1943_v61 = vld [vmem:[%s2353_s10 + $0x28] sm:$0xff]  }
 0x187   : > { %v815_v7 = vpack.c.bf16 %v813_v4, %v813_v4 }
 0x188   : > { %v814_v9 = vpack.c.bf16 %v812_v6, %v812_v6 }
 0x189   : > { %1660 = vmatprep.mubr.msk.bf16.mxu1 %vm884_vm13, %v815_v7  ;;  %1687 = vmatprep.mubr.msk.bf16.mxu0 %vm884_vm13, %v815_v7 }
 0x18a   : > { %924 = vmatmul.mubr.bf16.vlgmr.msra.gmra.mrb[8].mxu1 %v814_v9  ;;  %1036 = vmatmul.mubr.bf16.vlgmr.msra.gmra.mrb[4].mxu0 %v814_v9 }
 0x18b   : > { %1116 = vmatpush1.bf16.msra.mxu1 %v1914_v8  ;;  %1714 = vmatprep.mubr.msk.bf16.mxu1 %vm884_vm13, %v815_v7 }
 0x18c   : > { %1117 = vmatprep.subr.bf16.mxu1 %v1952_v2  ;;  %1794 = vmatpush3.bf16.msra.mxu0 %v1923_v19 }
 0x18d   : > { %1795 = vmatprep.subr.bf16.mxu0 %v1954_v21  ;;  %1803 = vmatprep.mubr.msk.bf16.mxu0 %vm1955_vm14, %v1954_v21 }
 0x18f   : > { %1118 = vmatpush1.bf16.msra.mxu1 %v1915_v10 }
 0x190   : > { %1119 = vmatprep.subr.bf16.mxu1 %v1952_v2 }
 0x193   : > { %1120 = vmatpush1.bf16.msra.mxu1 %v1916_v11 }
 0x194   : > { %1121 = vmatprep.subr.bf16.mxu1 %v1952_v2 }
 0x197   : > { %1122 = vmatpush1.bf16.msra.mxu1 %v1917_v12 }
 0x198   : > { %1123 = vmatprep.subr.bf16.mxu1 %v1952_v2 }
 0x19b   : > { %1124 = vmatpush1.bf16.msra.mxu1 %v1918_v13 }
 0x19c   : > { %1125 = vmatprep.subr.bf16.mxu1 %v1952_v2 }
 0x19f   : > { %1126 = vmatpush1.bf16.msra.mxu1 %v1919_v14  ;;  %v1755_v14 = vld [vmem:[%s2351_s8] ss:$0 sm:$0xff] }
 0x1a0   : > { %1127 = vmatprep.subr.bf16.mxu1 %v1952_v2 }
 0x1a3   : > { %1128 = vmatpush1.bf16.msra.mxu1 %v1920_v15 }
 0x1a4   : > { %1129 = vmatprep.subr.bf16.mxu1 %v1952_v2 }
 0x1a7   : > { %1130 = vmatpush1.bf16.msra.mxu1 %v1921_v16  ;;  %v1756_v16 = vld [vmem:[%s2352_s9] ss:$0 sm:$0xff] }
 0x1a8   : > { %1131 = vmatprep.subr.bf16.mxu1 %v1952_v2  ;;  %v1925_v2 = vld [vmem:[%s2350_s7 + $0x8] sm:$0xff]  }
 0x1a9   : > { %1796 = vmatpush3.bf16.msra.mxu0 %v1925_v2 }
 0x1aa   : > { %1797 = vmatprep.subr.bf16.mxu0 %v1954_v21 }
 0x1ab   : > { %1132 = vmatpush1.bf16.msra.mxu1 %v1113_v18 }
 0x1ac   : > { %1821 = vmatprep.subr.bf16.mxu1 %v1954_v21 }
 0x1ad   : > { %1798 = vmatpush3.bf16.msra.mxu0 %v1927_v23 }
 0x1ae   : > { %1148 = vmatmul.mubr.bf16.vlgmr.msra.gmra.mrb[12].mxu1 %v814_v9  ;;  %1799 = vmatprep.subr.bf16.mxu0 %v1954_v21 }
 0x1af   : > { %1822 = vmatpush3.bf16.msra.mxu1 %v1924_v20  ;;  %1831 = vmatprep.mubr.msk.bf16.mxu1 %vm1955_vm14, %v1954_v21 }
 0x1b0   : > { %1823 = vmatprep.subr.bf16.mxu1 %v1954_v21 }
 0x1b1   : > { %1800 = vmatpush3.bf16.msra.mxu0 %v1929_v25 }
 0x1b2   : > { %1801 = vmatprep.subr.bf16.mxu0 %v1954_v21 }
 0x1b3   : > { %1824 = vmatpush3.bf16.msra.mxu1 %v1926_v22 }
 0x1b4   : > { %1825 = vmatprep.subr.bf16.mxu1 %v1954_v21 }
 0x1b5   : > { %1802 = vmatpush3.bf16.msra.mxu0 %v1931_v27 }
 0x1b6   : > { %1807 = vmatprep.subr.bf16.mxu0 %v1954_v21 }
 0x1b7   : > { %1826 = vmatpush3.bf16.msra.mxu1 %v1928_v24 }
 0x1b8   : > { %1827 = vmatprep.subr.bf16.mxu1 %v1954_v21 }
 0x1bb   : > { %1828 = vmatpush3.bf16.msra.mxu1 %v1930_v26 }
 0x1bc   : > { %1829 = vmatprep.subr.bf16.mxu1 %v1954_v21 }
 0x1bf   : > { %1830 = vmatpush3.bf16.msra.mxu1 %v1932_v28 }
 0x25d   : > { %v925_v29 = vpop.f32.mrb[8].mxu1  ;;  %v1037_v30 = vpop.f32.mrb[4].mxu0 }
 0x25e   : > { %v1156_v31 = vrot.slane %v1037_v30, 1  ;;  %v927_v32 = vpop.f32.mrb[9].mxu1  ;;  %v1039_v33 = vpop.f32.mrb[5].mxu0 }
 0x25f   : > { %v928_v34 = vpop.f32.mrb[10].mxu1  ;;  %v1040_v35 = vpop.f32.mrb[6].mxu0 }
 0x260   : > { %v1158_v36 = vadd.f32 %v1156_v31, %v925_v29  ;;  %v929_v37 = vpop.f32.mrb[11].mxu1  ;;  %v1041_v38 = vpop.f32.mrb[7].mxu0 }
 0x281   : > { %v1149_v39 = vpop.f32.mrb[12].mxu1 }
 0x282   : > { %v1160_v40 = vrot.slane %v1149_v39, 2  ;;  %v1151_v41 = vpop.f32.mrb[13].mxu1 }
 0x283   : > { %v1152_v43 = vpop.f32.mrb[14].mxu1 }
 0x284   : > { %v1162_v44 = vadd.f32 %v1160_v40, %v1158_v36  ;;  %v1153_v45 = vpop.f32.mrb[15].mxu1 }
 0x286   : > { %v1170_v47 = vadd.f32 %v1715_v42, %v1162_v44 }
 0x288   : > { %vm1171_vm15 = vcmp.ge.f32.partialorder %v1170_v47, 0.0  ;;  %v1179_v48 = vmul.f32 %v1716_v46, %v1170_v47 }
 0x28a   : > { %v1180_v49 = vsel %vm1171_vm15, %v1170_v47, %v1179_v48 }
 0x28b   : > { %v1181_v51 = vpack.c.bf16 %v1180_v49, %v1180_v49 }
 0x28d   : > { %1804 = vmatmul.mubr.msk.bf16.vlgmr.msra.gmra.mrb[8].mxu0 %vm1222_vm0, %v1181_v51  ;;  %1832 = vmatmul.mubr.msk.bf16.vlgmr.msra.gmra.mrb[16].mxu1 %vm1222_vm0, %v1181_v51 }
 0x28e   : > { %1808 = vmatpush3.bf16.msra.mxu0 %v1933_v50  ;;  %1817 = vmatprep.mubr.msk.bf16.mxu0 %vm1955_vm14, %v1954_v21 }
 0x28f   : > { %1809 = vmatprep.subr.bf16.mxu0 %v1954_v21 }
 0x292   : > { %1810 = vmatpush3.bf16.msra.mxu0 %v1934_v52 }
 0x293   : > { %1811 = vmatprep.subr.bf16.mxu0 %v1954_v21 }
 0x296   : > { %1812 = vmatpush3.bf16.msra.mxu0 %v1935_v53 }
 0x297   : > { %1813 = vmatprep.subr.bf16.mxu0 %v1954_v21 }
 0x29a   : > { %1814 = vmatpush3.bf16.msra.mxu0 %v1936_v54 }
 0x29b   : > { %1815 = vmatprep.subr.bf16.mxu0 %v1954_v21 }
 0x29e   : > { %1816 = vmatpush3.bf16.msra.mxu0 %v1937_v55 }
 0x29f   : > { %1835 = vmatprep.subr.bf16.mxu0 %v1954_v21 }
 0x2a1   : > { %1818 = vmatmul.mubr.msk.bf16.vlgmr.msra.gmra.mrb[12].mxu0 %vm1222_vm0, %v1181_v51 }
 0x2a2   : > { %1847 = vmatprep.mubr.msk.bf16.mxu0 %vm1955_vm14, %v1954_v21  ;;  %1836 = vmatpush3.bf16.msra.mxu0 %v1938_v56 }
 0x2a3   : > { %1837 = vmatprep.subr.bf16.mxu0 %v1954_v21 }
 0x2a6   : > { %1838 = vmatpush3.bf16.msra.mxu0 %v1939_v57 }
 0x2a7   : > { %1839 = vmatprep.subr.bf16.mxu0 %v1954_v21 }
 0x2aa   : > { %1840 = vmatpush3.bf16.msra.mxu0 %v1940_v58 }
 0x2ab   : > { %1841 = vmatprep.subr.bf16.mxu0 %v1954_v21 }
 0x2ae   : > { %1842 = vmatpush3.bf16.msra.mxu0 %v1941_v59 }
 0x2af   : > { %1843 = vmatprep.subr.bf16.mxu0 %v1954_v21 }
 0x2b2   : > { %1844 = vmatpush3.bf16.msra.mxu0 %v1942_v60 }
 0x2b3   : > { %1845 = vmatprep.subr.bf16.mxu0 %v1954_v21  ;;  %v1757_v21 = vld [vmem:[%s2354_s11] ss:$0 sm:$0xff] }
 0x2b6   : > { %1846 = vmatpush3.bf16.msra.mxu0 %v1943_v61 }
 0x360   : > { %v1260_v62 = vpop.f32.mrb[8].mxu0  ;;  %v1422_v63 = vpop.f32.mrb[16].mxu1 }
 0x361   : > { %v1805_v0 = vpop.f32.mrb[9].mxu0  ;;  %v1833_v1 = vpop.f32.mrb[17].mxu1  ;;  %v1433_v11 = vrot.slane %v1422_v63, 2 }
 0x362   : > { %v1263_v3 = vpop.f32.mrb[10].mxu0  ;;  %v1425_v4 = vpop.f32.mrb[18].mxu1 }
 0x363   : > { %v1806_v5 = vpop.f32.mrb[11].mxu0  ;;  %v1834_v6 = vpop.f32.mrb[19].mxu1 }
 0x374   : > { %v1341_v7 = vpop.f32.mrb[12].mxu0 }
 0x375   : > { %v1429_v8 = vrot.slane %v1341_v7, 1  ;;  %v1819_v9 = vpop.f32.mrb[13].mxu0 }
 0x376   : > { %v1344_v10 = vpop.f32.mrb[14].mxu0 }
 0x377   : > { %v1431_v12 = vadd.f32 %v1429_v8, %v1260_v62  ;;  %v1820_v13 = vpop.f32.mrb[15].mxu0 }
 0x379   : > { %v1435_v15 = vadd.f32 %v1433_v11, %v1431_v12 }
 0x37b   : > { %v1443_v17 = vadd.f32 %v1755_v14, %v1435_v15 }
 0x37d   : > { %vm1444_vm1 = vcmp.ge.f32.partialorder %v1443_v17, 0.0  ;;  %v1452_v18 = vmul.f32 %v1756_v16, %v1443_v17 }
 0x37f   : > { %v1453_v19 = vsel %vm1444_vm1, %v1443_v17, %v1452_v18 }
 0x380   : > { %v1454_v20 = vpack.c.bf16 %v1453_v19, %v1453_v19 }
 0x382   : > { %1848 = vmatmul.mubr.msk.bf16.vlgmr.msra.gmra.mrb[16].mxu0 %vm1510_vm2, %v1454_v20 }
 0x455   : > { %v1548_v2 = vpop.f32.mrb[16].mxu0 }
 0x456   : > { %v1549_v22 = vadd.f32 %v1757_v21, %v1548_v2  ;;  %v1849_v23 = vpop.f32.mrb[17].mxu0 }
 0x457   : > { %v1551_v24 = vpop.f32.mrb[18].mxu0 }
 0x458   : > { %1555 = vst.msk [vmem:[%s411_s15] sm:$0x7] %vm1554_vm3, %v1549_v22  ;;  %v1850_v25 = vpop.f32.mrb[19].mxu0 }
 0x459 PF: > { %s22_s21 = sadd.s32 1, %s1950_s21  }
 0x45a   : > { %p19_p4 = scmp.ge.s32.totalorder %s22_s21, 4  }
 0x45c   :  { %21 = sbr.rel (!%p19_p4) target bundleno = 1 (0x1), region = 104 }

</bundles_post_ra>
